<compile_context>
chip_gen: v5e
topology: v5e:2x2
jax: 0.10.0
libtpu: 0.0.40
codegen_flags: <defaults>
</compile_context>

<pallas_src>
import math
from functools import partial

import jax
import jax.numpy as jnp
from jax import lax
from jax.experimental import pallas as pl
from jax.experimental.pallas import tpu as pltpu


# ---------------------------------------------------------------------------
# Parameter init (matches get_and_init_FC_layer: xavier_uniform with relu gain,
# zero bias).  Weights kept in PyTorch orientation (d_out, d_in), f32.
# ---------------------------------------------------------------------------
def init_foldingnet_params(key, dims, dtype=jnp.float32):
    params = []
    for i in range(1, len(dims)):
        key, sub = jax.random.split(key)
        d_in, d_out = dims[i - 1], dims[i]
        gain = math.sqrt(2.0)                          # calculate_gain('relu')
        bound = gain * math.sqrt(6.0 / (d_in + d_out))
        w = jax.random.uniform(sub, (d_out, d_in), dtype, minval=-bound, maxval=bound)
        b = jnp.zeros((d_out, 1), dtype=dtype)
        params.append((w, b))
    return params


# ---------------------------------------------------------------------------
# Kernel: full Linear/ReLU chain on one (tile_p, d_in) point-major tile.
# refs = (x_ref, w0, b0, w1, b1, ..., o_ref); output is feature-major
# (d_out, tile_p) so every store is lane-dense.
# ---------------------------------------------------------------------------
def _mlp_kernel(n_layers, x_ref, *refs):
    o_ref = refs[-1]
    p_refs = refs[:-1]

    h = x_ref[...]                                     # (tile_p, d_in), natural layout
    for l in range(n_layers):
        w = p_refs[2 * l][...]                         # (d_out_l, d_in_l), f32
        b = p_refs[2 * l + 1][...]                     # (d_out_l, 1), f32
        if l == 0:
            # w @ x^T via transposed-RHS contraction: MXU consumes the transposed
            # operand natively, so no x^T is ever materialized (in HBM or VMEM).
            h = lax.dot_general(w, h, (((1,), (1,)), ((), ())),
                                preferred_element_type=jnp.float32,
                                precision=lax.Precision.HIGHEST)
        else:
            h = jnp.dot(w, h, preferred_element_type=jnp.float32,
                        precision=lax.Precision.HIGHEST)
        h = h + b                                      # bias broadcast over lanes
        if l != n_layers - 1:                          # doLastRelu=False
            h = jnp.maximum(h, 0.0)
    o_ref[...] = h.astype(o_ref.dtype)                 # (d_out, tile_p), lane-dense


# ---------------------------------------------------------------------------
# Device-aware tile / VMEM-budget selection.
# ---------------------------------------------------------------------------
def _device_caps():
    kind = ""
    try:
        kind = (jax.devices()[0].device_kind or "").lower()
    except Exception:
        pass
    if "v7" in kind:
        # 2 TensorCores / chip, only 64 MiB physical VMEM per core.
        return {"max_tile": 16384, "two_cores": True, "vmem_limit": 48 * 1024 * 1024}
    # v5e / v6e: single TensorCore, 128 MiB physical VMEM (scoped default is small).
    return {"max_tile": 32768, "two_cores": False, "vmem_limit": 96 * 1024 * 1024}


def _choose_tile(n_points, max_tile, two_cores):
    if n_points <= 128:
        return n_points                                # single (possibly ragged) block
    if two_cores:
        # Keep >=2 grid steps so dimension_semantics=("parallel",) feeds both TCs.
        cap = max(128, ((n_points // 2) // 128) * 128)
    else:
        # Serial grid: the biggest 128-multiple tile minimizes per-step overhead.
        cap = (n_points // 128) * 128
    return max(128, min(max_tile, cap))


# ---------------------------------------------------------------------------
# pallas_call wrapper: 1-D grid over point tiles, weights/biases VMEM-resident
# via constant index_maps, ragged last block via pl.cdiv (no padding pass).
# ---------------------------------------------------------------------------
def _forward(x_flat, params, tile_p, vmem_limit, out_dtype):
    n_points, d_in = x_flat.shape
    n_layers = len(params)
    d_out = params[-1][0].shape[0]

    in_specs = [pl.BlockSpec((tile_p, d_in), lambda i: (i, 0))]
    flat_params = []
    for (w, b) in params:
        in_specs.append(pl.BlockSpec(w.shape, lambda i: (0, 0)))   # resident weight
        in_specs.append(pl.BlockSpec(b.shape, lambda i: (0, 0)))   # resident bias
        flat_params.extend([w, b])
    out_spec = pl.BlockSpec((d_out, tile_p), lambda i: (0, i))

    return pl.pallas_call(
        partial(_mlp_kernel, n_layers),
        out_shape=jax.ShapeDtypeStruct((d_out, n_points), out_dtype),
        grid=(pl.cdiv(n_points, tile_p),),
        in_specs=in_specs,
        out_specs=out_spec,
        compiler_params=pltpu.CompilerParams(
            dimension_semantics=("parallel",),
            vmem_limit_bytes=vmem_limit,
        ),
    )(x_flat, *flat_params)


@jax.jit
def foldingnet_single(x, params):
    """x: (..., d_in) -> (..., d_out), matching FoldingNetSingle.forward."""
    d_in = x.shape[-1]
    lead = x.shape[:-1]
    d_out = params[-1][0].shape[0]

    x_flat = x.reshape(-1, d_in)                       # free view, natural layout
    n_points = x_flat.shape[0]

    caps = _device_caps()
    tile_p = _choose_tile(n_points, caps["max_tile"], caps["two_cores"])

    yT = _forward(x_flat, params, tile_p, caps["vmem_limit"], out_dtype=x.dtype)
    # Only remaining wrapper layout pass: module semantics require (..., d_out).
    y = jnp.transpose(yT)                              # (P, d_out)
    return y.reshape(*lead, d_out)


# ---------------------------------------------------------------------------
# Plain-JAX f32 reference (same precision request) for correctness check.
# ---------------------------------------------------------------------------
def _reference(x, params):
    h = x.reshape(-1, x.shape[-1])
    for l, (w, b) in enumerate(params):
        h = jnp.dot(h, jnp.transpose(w), precision=lax.Precision.HIGHEST) + b[:, 0]
        if l != len(params) - 1:
            h = jnp.maximum(h, 0.0)
    return h.reshape(*x.shape[:-1], h.shape[-1]).astype(x.dtype)


if __name__ == "__main__":
    # Small pointwise-MLP shapes: batch=2, points=200 (ragged vs the 128-lane
    # tile), dims=(8, 32, 32, 4), doLastRelu=False.
    dims = (8, 32, 32, 4)
    B, N = 2, 200

    key = jax.random.PRNGKey(0)
    key_x, key_p = jax.random.split(key)
    x = jax.random.normal(key_x, (B, N, dims[0]), dtype=jnp.float32)
    params = init_foldingnet_params(key_p, dims)

    y = jax.block_until_ready(foldingnet_single(x, params))
    ref = jax.block_until_ready(_reference(x, params))

    assert y.shape == (B, N, dims[-1])
    assert y.dtype == x.dtype
    assert jnp.allclose(y, ref, atol=1e-3, rtol=1e-3), float(jnp.max(jnp.abs(y - ref)))

    print("KERNEL_OK")
</pallas_src>

<mosaic_0001>
module attributes {stable_mosaic.version = 11 : i64} {
  func.func @_mlp_kernel(%arg0: i32, %arg1: memref<384x8xf32, #tpu.memory_space<vmem>>, %arg2: memref<32x8xf32, #tpu.memory_space<vmem>>, %arg3: memref<32x1xf32, #tpu.memory_space<vmem>>, %arg4: memref<32x32xf32, #tpu.memory_space<vmem>>, %arg5: memref<32x1xf32, #tpu.memory_space<vmem>>, %arg6: memref<4x32xf32, #tpu.memory_space<vmem>>, %arg7: memref<4x1xf32, #tpu.memory_space<vmem>>, %arg8: memref<4x384xf32, #tpu.memory_space<vmem>>) attributes {dimension_semantics = [#tpu.dimension_semantics<parallel>], iteration_bounds = array<i64: 2>, scalar_prefetch = 0 : i64, scratch_operands = 0 : i64, tpu.core_type = #tpu.core_type<tc>, window_params = [{transform_indices = @transform_0, window_bounds = array<i64: 384, 8>}, {pipeline_mode = #tpu.pipeline_mode<synchronous>, transform_indices = @transform_1, window_bounds = array<i64: 32, 8>}, {pipeline_mode = #tpu.pipeline_mode<synchronous>, transform_indices = @transform_2, window_bounds = array<i64: 32, 1>}, {pipeline_mode = #tpu.pipeline_mode<synchronous>, transform_indices = @transform_3, window_bounds = array<i64: 32, 32>}, {pipeline_mode = #tpu.pipeline_mode<synchronous>, transform_indices = @transform_4, window_bounds = array<i64: 32, 1>}, {pipeline_mode = #tpu.pipeline_mode<synchronous>, transform_indices = @transform_5, window_bounds = array<i64: 4, 32>}, {pipeline_mode = #tpu.pipeline_mode<synchronous>, transform_indices = @transform_6, window_bounds = array<i64: 4, 1>}, {transform_indices = @transform_7, window_bounds = array<i64: 4, 384>}]} {
    %c0 = arith.constant 0 : index
    %c0_0 = arith.constant 0 : index
    %0 = vector.load %arg1[%c0, %c0_0] : memref<384x8xf32, #tpu.memory_space<vmem>>, vector<384x8xf32>
    %c0_1 = arith.constant 0 : index
    %c0_2 = arith.constant 0 : index
    %1 = vector.load %arg2[%c0_1, %c0_2] : memref<32x8xf32, #tpu.memory_space<vmem>>, vector<32x8xf32>
    %c0_3 = arith.constant 0 : index
    %c0_4 = arith.constant 0 : index
    %2 = vector.load %arg3[%c0_3, %c0_4] : memref<32x1xf32, #tpu.memory_space<vmem>>, vector<32x1xf32>
    %cst = arith.constant dense<0.000000e+00> : vector<32x384xf32>
    %3 = tpu.matmul %1, %0, %cst {dimension_numbers = #tpu.dot_dimension_numbers<[1], [1], [0], [0], [0, 0, 1, 0], [], []>, precision = #tpu.contract_precision<fp32>} : vector<32x8xf32>, vector<384x8xf32>, vector<32x384xf32> -> vector<32x384xf32>
    %4 = vector.broadcast %2 : vector<32x1xf32> to vector<32x384xf32>
    %5 = arith.addf %3, %4 : vector<32x384xf32>
    %cst_5 = arith.constant 0.000000e+00 : f32
    %6 = vector.broadcast %cst_5 : f32 to vector<32x384xf32>
    %7 = arith.maximumf %5, %6 : vector<32x384xf32>
    %c0_6 = arith.constant 0 : index
    %c0_7 = arith.constant 0 : index
    %8 = vector.load %arg4[%c0_6, %c0_7] : memref<32x32xf32, #tpu.memory_space<vmem>>, vector<32x32xf32>
    %c0_8 = arith.constant 0 : index
    %c0_9 = arith.constant 0 : index
    %9 = vector.load %arg5[%c0_8, %c0_9] : memref<32x1xf32, #tpu.memory_space<vmem>>, vector<32x1xf32>
    %cst_10 = arith.constant dense<0.000000e+00> : vector<32x384xf32>
    %10 = tpu.matmul %8, %7, %cst_10 {dimension_numbers = #tpu.dot_dimension_numbers<[1], [0], [0], [1], [0, 0, 1, 1], [], []>, precision = #tpu.contract_precision<fp32>} : vector<32x32xf32>, vector<32x384xf32>, vector<32x384xf32> -> vector<32x384xf32>
    %11 = vector.broadcast %9 : vector<32x1xf32> to vector<32x384xf32>
    %12 = arith.addf %10, %11 : vector<32x384xf32>
    %cst_11 = arith.constant 0.000000e+00 : f32
    %13 = vector.broadcast %cst_11 : f32 to vector<32x384xf32>
    %14 = arith.maximumf %12, %13 : vector<32x384xf32>
    %c0_12 = arith.constant 0 : index
    %c0_13 = arith.constant 0 : index
    %15 = vector.load %arg6[%c0_12, %c0_13] : memref<4x32xf32, #tpu.memory_space<vmem>>, vector<4x32xf32>
    %c0_14 = arith.constant 0 : index
    %c0_15 = arith.constant 0 : index
    %16 = vector.load %arg7[%c0_14, %c0_15] : memref<4x1xf32, #tpu.memory_space<vmem>>, vector<4x1xf32>
    %cst_16 = arith.constant dense<0.000000e+00> : vector<4x384xf32>
    %17 = tpu.matmul %15, %14, %cst_16 {dimension_numbers = #tpu.dot_dimension_numbers<[1], [0], [0], [1], [0, 0, 1, 1], [], []>, precision = #tpu.contract_precision<fp32>} : vector<4x32xf32>, vector<32x384xf32>, vector<4x384xf32> -> vector<4x384xf32>
    %18 = vector.broadcast %16 : vector<4x1xf32> to vector<4x384xf32>
    %19 = arith.addf %17, %18 : vector<4x384xf32>
    %c0_17 = arith.constant 0 : index
    %c0_18 = arith.constant 0 : index
    %20 = vector.load %arg8[%c0_17, %c0_18] : memref<4x384xf32, #tpu.memory_space<vmem>>, vector<4x384xf32>
    tpu.vector_store %arg8[%c0_17, %c0_18], %19 {strides = array<i32>} : memref<4x384xf32, #tpu.memory_space<vmem>>, vector<4x384xf32>,
    return
  }
  func.func @transform_0(%arg0: i32) -> (i32, i32) {
    %c0_i32 = arith.constant 0 : i32
    %c0_i32_0 = arith.constant 0 : i32
    return %arg0, %c0_i32 : i32, i32
  }
  func.func @transform_1(%arg0: i32) -> (i32, i32) {
    %c0_i32 = arith.constant 0 : i32
    %c0_i32_0 = arith.constant 0 : i32
    %c0_i32_1 = arith.constant 0 : i32
    return %c0_i32, %c0_i32_0 : i32, i32
  }
  func.func @transform_2(%arg0: i32) -> (i32, i32) {
    %c0_i32 = arith.constant 0 : i32
    %c0_i32_0 = arith.constant 0 : i32
    %c0_i32_1 = arith.constant 0 : i32
    return %c0_i32, %c0_i32_0 : i32, i32
  }
  func.func @transform_3(%arg0: i32) -> (i32, i32) {
    %c0_i32 = arith.constant 0 : i32
    %c0_i32_0 = arith.constant 0 : i32
    %c0_i32_1 = arith.constant 0 : i32
    return %c0_i32, %c0_i32_0 : i32, i32
  }
  func.func @transform_4(%arg0: i32) -> (i32, i32) {
    %c0_i32 = arith.constant 0 : i32
    %c0_i32_0 = arith.constant 0 : i32
    %c0_i32_1 = arith.constant 0 : i32
    return %c0_i32, %c0_i32_0 : i32, i32
  }
  func.func @transform_5(%arg0: i32) -> (i32, i32) {
    %c0_i32 = arith.constant 0 : i32
    %c0_i32_0 = arith.constant 0 : i32
    %c0_i32_1 = arith.constant 0 : i32
    return %c0_i32, %c0_i32_0 : i32, i32
  }
  func.func @transform_6(%arg0: i32) -> (i32, i32) {
    %c0_i32 = arith.constant 0 : i32
    %c0_i32_0 = arith.constant 0 : i32
    %c0_i32_1 = arith.constant 0 : i32
    return %c0_i32, %c0_i32_0 : i32, i32
  }
  func.func @transform_7(%arg0: i32) -> (i32, i32) {
    %c0_i32 = arith.constant 0 : i32
    %c0_i32_0 = arith.constant 0 : i32
    return %c0_i32, %arg0 : i32, i32
  }
}

</mosaic_0001>

<bundles_post_ra>
// kernel: foldingnet_single.1
= control target key start
LH: loop header
LB: loop body
LE: loop exit
PB: predicated region body
PF: predicated region fallthrough
CT: control target
= control target key end

     0   :  { %s4115_s24 = smov 0   ;;  %s4117_s25 = smov 0   ;;  %s5792_s0 = inlined_call_operand.vmem [shape: f32[400,8], index: 0, kind: input, shape index: {}]   ;;  %s5793_s1 = inlined_call_operand.vmem [shape: f32[32,8], index: 1, kind: input, shape index: {}]   ;;  %s5794_s2 = inlined_call_operand.vmem [shape: f32[32,1], index: 2, kind: input, shape index: {}]   ;;  %s5795_s3 = inlined_call_operand.vmem [shape: f32[32,32], index: 3, kind: input, shape index: {}]   ;;  %s5796_s4 = inlined_call_operand.vmem [shape: f32[32,1], index: 4, kind: input, shape index: {}]   ;;  %s5797_s5 = inlined_call_operand.vmem [shape: f32[4,32], index: 5, kind: input, shape index: {}]   ;;  %s5798_s6 = inlined_call_operand.vmem [shape: f32[4,1], index: 6, kind: input, shape index: {}]   ;;  %s5799_s7 = inlined_call_operand.vmem [shape: f32[4,400], index: 7, kind: output, shape index: {}]  }
   0x1   :  { %s4119_s26 = smov 0  }
   0x2 LB: > { %s4128_s27 = sadd.s32 4294967295, %s4006_s26   ;;  %s4130_s28 = sadd.s32 1, %s4006_s26   ;;  %s4006_s26 = sphi %s4119_s26, %s5942_s26   ;;  %s4002_s25 = sphi %s4117_s25, %s5941_s25   ;;  %s3998_s24 = sphi %s4115_s24, %s5940_s24  }
   0x3   : > { %s173_s29 = ssub.s32 %s4006_s26, %s4130_s28  ;;  %s176_s30 = sadd.s32 1, %s4002_s25 }
   0x4   : > { %p174_p0 = scmp.eq.s32.totalorder %s173_s29, 0  ;;  %p186_p1 = scmp.ne.s32.totalorder %s4002_s25, %s3998_s24 }
   0x5   : > { %p187_p2 = scmp.eq.s32.totalorder %s4128_s27, 1  ;;  %p3725_p3 = scmp.ge.s32.totalorder %s4006_s26, 1 }
   0x6   : > { %s4138_s8 = scalar_select %p174_p0, %s4002_s25, %s176_s30  }
   0x7   : > { %p4140_p4 = por %p187_p2, %p186_p1  ;;  %p246_p5 = scmp.lt.s32.totalorder %s4006_s26, 3 }
   0x9   : > { %p247_p6 = pnand %p3725_p3, %p246_p5 }
   0xb   : > { %250 = sbr.rel (%p247_p6) target bundleno = 1014 (0x3f6), region = 48 }
  0x10   : > { %s281_s10 = smul.u32 48, %s4128_s27  ;;  %vm376_vm0 = vcmask 64512   ;;  %vm1875_vm1 = vcmask 261120   ;;  %s278_s18 = sand.u32 1, %s3998_s24   ;;  %vm3302_vm2 = vcmask 1043456  }
  0x11   : > { %s3314_s24 = smul.u32 (%p4140_p4), 3, %s4128_s27 }
  0x12   : > { %p286_p7 = scmp.lt.s32.totalorder %s281_s10, 49  ;;  %s3756_s20 = smul.u32 (%p4140_p4), 12, %s4128_s27 }
  0x13   : > { %s3315_s21 = ssub.s32 (%p4140_p4), 4, %s3314_s24 }
  0x14   : > { %s5944_s10 = smov (!%p286_p7, %s281_s10), 49  ;;  %p3316_p8 = scmp.lt.s32.totalorder (%p4140_p4), %s3315_s21, 3 }
  0x15   : > { %s3726_s11 = sshll.u32 %s5944_s10, 3  ;;  %s5504_s26 = scalar_lea.vmem (%p4140_p4), %s5799_s7, %s3756_s20  }
  0x16   : > { %s4148_s14 = scalar_lea.vmem %s5792_s0, %s3726_s11 }
  0x17   : > { %v315_v0 = vld [vmem:[%s4148_s14 + $0x78] sm:$0xff]  ;;  %v314_v1 = vld [vmem:[%s4148_s14 + $0x70] sm:$0xff]  ;;  %v313_v2 = vld [vmem:[%s4148_s14 + $0x68] sm:$0xff] }
  0x18   : > { %v435_v3 = vsel %vm376_vm0, %v315_v0, 0  ;;  %v432_v4 = vsel %vm376_vm0, %v314_v1, 0  ;;  %v429_v5 = vsel %vm376_vm0, %v313_v2, 0  ;;  %v312_v6 = vld [vmem:[%s4148_s14 + $0x60] sm:$0xff]  ;;  %v311_v7 = vld [vmem:[%s4148_s14 + $0x58] sm:$0xff]  ;;  %v310_v17 = vld [vmem:[%s4148_s14 + $0x50] sm:$0xff] }
  0x19   : > { %v4158_v8 = vand.u32 4294901760, %v435_v3  ;;  %v4160_v9 = vand.u32 4294901760, %v432_v4  ;;  %v4162_v10 = vand.u32 4294901760, %v429_v5  ;;  %v426_v11 = vsel %vm376_vm0, %v312_v6, 0  ;;  %v309_v26 = vld [vmem:[%s4148_s14 + $0x48] sm:$0xff]  ;;  %v308_v34 = vld [vmem:[%s4148_s14 + $0x40] sm:$0xff] }
  0x1a   : > { %v4165_v12 = vand.u32 4294901760, %v426_v11  ;;  %v423_v16 = vsel %vm376_vm0, %v311_v7, 0  ;;  %v420_v21 = vsel %vm376_vm0, %v310_v17, 0  ;;  %v417_v29 = vsel %vm376_vm0, %v309_v26, 0  ;;  %v307_v41 = vld [vmem:[%s4148_s14 + $0x38] sm:$0xff]  ;;  %v306_v48 = vld [vmem:[%s4148_s14 + $0x30] sm:$0xff] }
  0x1b   : > { %534 = vmatpush.xpose.msra.mxu0 %v4158_v8  ;;  %v4169_v13 = vsub.f32 %v435_v3, %v4158_v8  ;;  %781 = vmatpush.xpose.msra.mxu3 %v4158_v8  ;;  %v4173_v14 = vsub.f32 %v432_v4, %v4160_v9  ;;  %v4176_v15 = vsub.f32 %v429_v5, %v4162_v10  ;;  %v4183_v20 = vand.u32 4294901760, %v423_v16  ;;  %v305_v54 = vld [vmem:[%s4148_s14 + $0x28] sm:$0xff]  ;;  %v304_v62 = vld [vmem:[%s4148_s14 + $0x20] sm:$0xff]  ;;  %v303_v5 = vld [vmem:[%s4148_s14 + $0x18] sm:$0xff] }
  0x1c   : > { %v4196_v25 = vsub.f32 %v426_v11, %v4165_v12  ;;  %v4200_v28 = vand.u32 4294901760, %v420_v21  ;;  %v4214_v35 = vand.u32 4294901760, %v417_v29  ;;  %v414_v40 = vsel %vm376_vm0, %v308_v34, 0 }
  0x1d   : > { %713 = vmatpush.xpose.msra.mxu2 %v4169_v13  ;;  %v600_v18 = vand.u32 4294901760, %v4169_v13  ;;  %v606_v19 = vand.u32 4294901760, %v4173_v14  ;;  %v612_v24 = vand.u32 4294901760, %v4176_v15  ;;  %v4209_v33 = vsub.f32 %v423_v16, %v4183_v20 }
  0x1e   : > { %v5815_v32 = vand.u32 4294901760, %v4196_v25  ;;  %v4222_v39 = vsub.f32 %v420_v21, %v4200_v28  ;;  %v4229_v42 = vsub.f32 %v417_v29, %v4214_v35  ;;  %v4235_v45 = vand.u32 4294901760, %v414_v40 }
  0x1f   : > { %536 = vmatpush.xpose.msra.mxu0 %v4160_v9  ;;  %v601_v22 = vsub.f32 %v4169_v13, %v600_v18  ;;  %783 = vmatpush.xpose.msra.mxu3 %v4160_v9  ;;  %v607_v23 = vsub.f32 %v4173_v14, %v606_v19  ;;  %v613_v31 = vsub.f32 %v4176_v15, %v612_v24  ;;  %v5814_v38 = vand.u32 4294901760, %v4209_v33 }
  0x20   : > { %v619_v37 = vsub.f32 %v4196_v25, %v5815_v32  ;;  %v5813_v46 = vand.u32 4294901760, %v4222_v39  ;;  %v411_v47 = vsel %vm376_vm0, %v307_v41, 0  ;;  %v5810_v49 = vand.u32 4294901760, %v4229_v42  ;;  %v330_v41 = vld [vmem:[%s4148_s14 + $0xf0] sm:$0xff] }
  0x21   : > { %v602_v27 = vand.u32 4294901760, %v601_v22  ;;  %716 = vmatpush.xpose.msra.mxu2 %v4173_v14  ;;  %v608_v30 = vand.u32 4294901760, %v607_v23  ;;  %v614_v36 = vand.u32 4294901760, %v613_v31  ;;  %v625_v44 = vsub.f32 %v4209_v33, %v5814_v38  ;;  %v302_v22 = vld [vmem:[%s4148_s14 + $0x10] sm:$0xff]  ;;  %v331_v31 = vld [vmem:[%s4148_s14 + $0xf8] sm:$0xff] }
  0x22   : > { %v620_v43 = vand.u32 4294901760, %v619_v37  ;;  %v631_v51 = vsub.f32 %v4222_v39, %v5813_v46  ;;  %v4247_v52 = vand.u32 4294901760, %v411_v47  ;;  %v4250_v53 = vsub.f32 %v414_v40, %v4235_v45 }
  0x23   : > { %538 = vmatpush.xpose.msra.mxu0 %v4162_v10  ;;  %603 = vmatpush.xpose.msra.mxu1 %v602_v27  ;;  %v626_v50 = vand.u32 4294901760, %v625_v44  ;;  %v408_v55 = vsel %vm376_vm0, %v306_v48, 0  ;;  %v637_v56 = vsub.f32 %v4229_v42, %v5810_v49  ;;  %v405_v57 = vsel %vm376_vm0, %v305_v54, 0 }
  0x24   : > { %785 = vmatpush.xpose.msra.mxu3 %v4162_v10  ;;  %v632_v58 = vand.u32 4294901760, %v631_v51  ;;  %v4261_v59 = vand.u32 4294901760, %v408_v55  ;;  %v5808_v60 = vand.u32 4294901760, %v4250_v53  ;;  %v4265_v61 = vsub.f32 %v411_v47, %v4247_v52  ;;  %v300_v51 = vld [vmem:[%s4148_s14] sm:$0xff] }
  0x25   : > { %719 = vmatpush.xpose.msra.mxu2 %v4176_v15  ;;  %v638_v63 = vand.u32 4294901760, %v637_v56  ;;  %v4270_v0 = vand.u32 4294901760, %v405_v57  ;;  %v402_v4 = vsel %vm376_vm0, %v304_v62, 0  ;;  %v399_v21 = vsel %vm376_vm0, %v303_v5, 0 }
  0x26   : > { %v643_v1 = vsub.f32 %v4250_v53, %v5808_v60  ;;  %v5807_v2 = vand.u32 4294901760, %v4265_v61  ;;  %v4278_v3 = vsub.f32 %v408_v55, %v4261_v59  ;;  %v4284_v6 = vand.u32 4294901760, %v402_v4  ;;  %v325_v60 = vld [vmem:[%s4148_s14 + $0xc8] sm:$0xff] }
  0x27   : > { %540 = vmatpush.xpose.msra.mxu0 %v4165_v12  ;;  %609 = vmatpush.xpose.msra.mxu1 %v608_v30  ;;  %v4292_v17 = vsub.f32 %v405_v57, %v4270_v0  ;;  %v4305_v29 = vand.u32 4294901760, %v399_v21  ;;  %v396_v34 = vsel %vm376_vm0, %v302_v22, 0  ;;  %v483_v40 = vsel %vm376_vm0, %v331_v31, 0  ;;  %v329_v57 = vld [vmem:[%s4148_s14 + $0xe8] sm:$0xff]  ;;  %v328_v22 = vld [vmem:[%s4148_s14 + $0xe0] sm:$0xff] }
  0x28   : > { %787 = vmatpush.xpose.msra.mxu3 %v4165_v12  ;;  %v644_v7 = vand.u32 4294901760, %v643_v1  ;;  %v649_v11 = vsub.f32 %v4265_v61, %v5807_v2  ;;  %v5806_v16 = vand.u32 4294901760, %v4278_v3  ;;  %v4299_v23 = vsub.f32 %v402_v4, %v4284_v6 }
  0x29   : > { %722 = vmatpush.xpose.msra.mxu2 %v4196_v25  ;;  %v5804_v30 = vand.u32 4294901760, %v4292_v17  ;;  %v4320_v47 = vand.u32 4294901760, %v396_v34  ;;  %v4323_v48 = vsub.f32 %v399_v21, %v4305_v29  ;;  %v4329_v54 = vand.u32 4294901760, %v483_v40 }
  0x2a   : > { %v650_v26 = vand.u32 4294901760, %v649_v11  ;;  %v655_v27 = vsub.f32 %v4278_v3, %v5806_v16  ;;  %v5802_v37 = vand.u32 4294901760, %v4299_v23  ;;  %v480_v55 = vsel %vm376_vm0, %v330_v41, 0 }
  0x2b   : > { %542 = vmatpush.xpose.msra.mxu0 %v4183_v20  ;;  %615 = vmatpush.xpose.msra.mxu1 %v614_v36  ;;  %v301_v36 = vld [vmem:[%s4148_s14 + $0x8] sm:$0xff]  ;;  %v661_v44 = vsub.f32 %v4292_v17, %v5804_v30  ;;  %v4341_v1 = vsub.f32 %v396_v34, %v4320_v47  ;;  %v390_v4 = vsel %vm376_vm0, %v300_v51, 0  ;;  %v4345_v5 = vand.u32 4294901760, %v480_v55 }
  0x2c   : > { %789 = vmatpush.xpose.msra.mxu3 %v4183_v20  ;;  %v667_v56 = vsub.f32 %v4299_v23, %v5802_v37  ;;  %v477_v11 = vsel %vm376_vm0, %v329_v57, 0  ;;  %v465_v13 = vsel %vm376_vm0, %v325_v60, 0 }
  0x2d   : > { %725 = vmatpush.xpose.msra.mxu2 %v4209_v33  ;;  %v5800_v31 = vand.u32 4294901760, %v4341_v1  ;;  %v4460_v32 = vand.u32 4294901760, %v465_v13 }
  0x2e   : > { %v668_v21 = vand.u32 4294901760, %v667_v56  ;;  %v327_v56 = vld [vmem:[%s4148_s14 + $0xd8] sm:$0xff] }
  0x2f   : > { %544 = vmatpush.xpose.msra.mxu0 %v4200_v28  ;;  %621 = vmatpush.xpose.msra.mxu1 %v620_v43  ;;  %v656_v43 = vand.u32 4294901760, %v655_v27  ;;  %v4357_v27 = vand.u32 4294901760, %v390_v4 }
  0x30   : > { %791 = vmatpush.xpose.msra.mxu3 %v4200_v28 }
  0x31   : > { %728 = vmatpush.xpose.msra.mxu2 %v4222_v39 }
  0x33   : > { %546 = vmatpush.xpose.msra.mxu0 %v4214_v35  ;;  %627 = vmatpush.xpose.msra.mxu1 %v626_v50  ;;  %v393_v50 = vsel %vm376_vm0, %v301_v36, 0  ;;  %v4365_v36 = vsub.f32 %v480_v55, %v4345_v5  ;;  %v4378_v55 = vsub.f32 %v390_v4, %v4357_v27  ;;  %v348_v4 = vld [vmem:[%s5793_s1] sm:$0xff] }
  0x34   : > { %793 = vmatpush.xpose.msra.mxu3 %v4214_v35  ;;  %v4337_v62 = vand.u32 4294901760, %v393_v50 }
  0x35   : > { %731 = vmatpush.xpose.msra.mxu2 %v4229_v42  ;;  %v5809_v57 = vand.u32 4294901760, %v4365_v36  ;;  %v5812_v37 = vand.u32 4294901760, %v4378_v55 }
  0x36   : > { %v4361_v34 = vsub.f32 %v393_v50, %v4337_v62  ;;  %v679_v50 = vsub.f32 %v4341_v1, %v5800_v31  ;;  %v378_v31 = vsel %vm376_vm0, %v348_v4, 0 }
  0x37   : > { %548 = vmatpush.xpose.msra.mxu0 %v4235_v45  ;;  %633 = vmatpush.xpose.msra.mxu1 %v632_v58  ;;  %v662_v58 = vand.u32 4294901760, %v661_v44  ;;  %v4403_v30 = vand.u32 4294901760, %v378_v31 }
  0x38   : > { %795 = vmatpush.xpose.msra.mxu3 %v4235_v45  ;;  %v5805_v51 = vand.u32 4294901760, %v4361_v34 }
  0x39   : > { %734 = vmatpush.xpose.msra.mxu2 %v4250_v53  ;;  %v4417_v16 = vsub.f32 %v378_v31, %v4403_v30 }
  0x3b   : > { %550 = vmatpush.xpose.msra.mxu0 %v4247_v52  ;;  %639 = vmatpush.xpose.msra.mxu1 %v638_v63  ;;  %v5801_v63 = vand.u32 4294901760, %v4323_v48  ;;  %5861 = vst [vmem:[#allocation3_spill] sm:$0xff] %v4417_v16  ;;  %v4426_v49 = vand.u32 4294901760, %v4417_v16 }
  0x3c   : > { %797 = vmatpush.xpose.msra.mxu3 %v4247_v52 }
  0x3d   : > { %737 = vmatpush.xpose.msra.mxu2 %v4265_v61  ;;  %5862 = vst [vmem:[#allocation4_spill] sm:$0xff] %v4426_v49 }
  0x3f   : > { %552 = vmatpush.xpose.msra.mxu0 %v4261_v59  ;;  %645 = vmatpush.xpose.msra.mxu1 %v644_v7  ;;  %v4349_v7 = vsub.f32 %v483_v40, %v4329_v54  ;;  %v4367_v40 = vand.u32 4294901760, %v477_v11 }
  0x40   : > { %799 = vmatpush.xpose.msra.mxu3 %v4261_v59 }
  0x41   : > { %740 = vmatpush.xpose.msra.mxu2 %v4278_v3  ;;  %v5803_v41 = vand.u32 4294901760, %v4349_v7 }
  0x43   : > { %554 = vmatpush.xpose.msra.mxu0 %v4270_v0  ;;  %651 = vmatpush.xpose.msra.mxu1 %v650_v26  ;;  %v673_v26 = vsub.f32 %v4323_v48, %v5801_v63  ;;  %v685_v63 = vsub.f32 %v4361_v34, %v5805_v51 }
  0x44   : > { %801 = vmatpush.xpose.msra.mxu3 %v4270_v0 }
  0x45   : > { %743 = vmatpush.xpose.msra.mxu2 %v4292_v17  ;;  %v674_v44 = vand.u32 4294901760, %v673_v26  ;;  %v471_v26 = vsel %vm376_vm0, %v327_v56, 0  ;;  %v1041_v56 = vsub.f32 %v4365_v36, %v5809_v57  ;;  %v686_v57 = vand.u32 4294901760, %v685_v63 }
  0x46   : > { %v4414_v51 = vand.u32 4294901760, %v471_v26 }
  0x47   : > { %556 = vmatpush.xpose.msra.mxu0 %v4284_v6  ;;  %657 = vmatpush.xpose.msra.mxu1 %v656_v43  ;;  %v474_v43 = vsel %vm376_vm0, %v328_v22, 0  ;;  %v1035_v22 = vsub.f32 %v4349_v7, %v5803_v41  ;;  %v326_v41 = vld [vmem:[%s4148_s14 + $0xd0] sm:$0xff]  ;;  %v1042_v31 = vand.u32 4294901760, %v1041_v56  ;;  %v349_v56 = vld [vmem:[%s5793_s1 + $0x8] sm:$0xff] }
  0x48   : > { %803 = vmatpush.xpose.msra.mxu3 %v4284_v6  ;;  %v468_v2 = vsel %vm376_vm0, %v326_v41, 0 }
  0x49   : > { %746 = vmatpush.xpose.msra.mxu2 %v4299_v23 }
  0x4b   : > { %558 = vmatpush.xpose.msra.mxu0 %v4305_v29  ;;  %663 = vmatpush.xpose.msra.mxu1 %v662_v58  ;;  %v4384_v58 = vsub.f32 %v477_v11, %v4367_v40  ;;  %v680_v11 = vand.u32 4294901760, %v679_v50  ;;  %v1036_v50 = vand.u32 4294901760, %v1035_v22  ;;  %v4437_v22 = vsub.f32 %v471_v26, %v4414_v51 }
  0x4c   : > { %805 = vmatpush.xpose.msra.mxu3 %v4305_v29 }
  0x4d   : > { %749 = vmatpush.xpose.msra.mxu2 %v4323_v48  ;;  %v5811_v4 = vand.u32 4294901760, %v4384_v58 }
  0x4f   : > { %560 = vmatpush.xpose.msra.mxu0 %v4320_v47  ;;  %669 = vmatpush.xpose.msra.mxu1 %v668_v21  ;;  %v4386_v21 = vand.u32 4294901760, %v474_v43  ;;  %v1047_v41 = vsub.f32 %v4384_v58, %v5811_v4  ;;  %v324_v4 = vld [vmem:[%s4148_s14 + $0xc0] sm:$0xff] }
  0x50   : > { %807 = vmatpush.xpose.msra.mxu3 %v4320_v47 }
  0x51   : > { %752 = vmatpush.xpose.msra.mxu2 %v4341_v1  ;;  %v1048_v60 = vand.u32 4294901760, %v1047_v41 }
  0x53   : > { %562 = vmatpush.xpose.msra.mxu0 %v4337_v62  ;;  %675 = vmatpush.xpose.msra.mxu1 %v674_v44  ;;  %v4411_v44 = vsub.f32 %v474_v43, %v4386_v21  ;;  %v691_v43 = vsub.f32 %v4378_v55, %v5812_v37  ;;  %v381_v37 = vsel %vm376_vm0, %v349_v56, 0 }
  0x54   : > { %809 = vmatpush.xpose.msra.mxu3 %v4337_v62  ;;  %v4452_v46 = vand.u32 4294901760, %v381_v37 }
  0x55   : > { %755 = vmatpush.xpose.msra.mxu2 %v4361_v34  ;;  %v5817_v63 = vand.u32 4294901760, %v4411_v44 }
  0x56   : > { %v4470_v14 = vsub.f32 %v381_v37, %v4452_v46 }
  0x57   : > { %564 = vmatpush.xpose.msra.mxu0 %v4357_v27  ;;  %681 = vmatpush.xpose.msra.mxu1 %v680_v11  ;;  %v4439_v11 = vand.u32 4294901760, %v468_v2  ;;  %v1053_v38 = vsub.f32 %v4411_v44, %v5817_v63 }
  0x58   : > { %811 = vmatpush.xpose.msra.mxu3 %v4357_v27  ;;  %5863 = vst [vmem:[#allocation5_spill] sm:$0xff] %v4470_v14  ;;  %v4475_v41 = vand.u32 4294901760, %v4470_v14 }
  0x59   : > { %758 = vmatpush.xpose.msra.mxu2 %v4378_v55 }
  0x5a   : > { %5864 = vst [vmem:[#allocation6_spill] sm:$0xff] %v4475_v41  ;;  %v576_v15 = vsub.f32 %v4470_v14, %v4475_v41 }
  0x5b   : > { %840 = vmatpush.xpose.msrb.mxu0 %v600_v18  ;;  %v568_v18 = vsub.f32 %v4417_v16, %v4426_v49  ;;  %687 = vmatpush.xpose.msra.mxu1 %v686_v57  ;;  %v5816_v57 = vand.u32 4294901760, %v4437_v22 }
  0x5c   : > { %1037 = vmatpush.xpose.msrb.mxu3 %v1036_v50  ;;  %v692_v50 = vand.u32 4294901760, %v691_v43  ;;  %761 = vmatmul.f32.vlgmr.msra.gmra.mxu2 %v4417_v16  ;;  %v4465_v43 = vsub.f32 %v468_v2, %v4439_v11  ;;  %v1054_v2 = vand.u32 4294901760, %v1053_v38  ;;  %v322_v38 = vld [vmem:[%s4148_s14 + $0xb0] sm:$0xff] }
  0x5d   : > { %968 = vmatpush.xpose.msrb.mxu2 %v4329_v54  ;;  %v4450_v26 = vand.u32 4294901760, %v568_v18  ;;  %815 = vmatmul.f32.vlgmr.msra.gmra.mxu3 %v4426_v49  ;;  %v462_v18 = vsel %vm376_vm0, %v324_v4, 0  ;;  %v4481_v4 = vsub.f32 %v465_v13, %v4460_v32  ;;  %v1059_v37 = vsub.f32 %v4437_v22, %v5816_v57 }
  0x5e   : > { %v4499_v13 = vand.u32 4294901760, %v576_v15  ;;  %v5867_v15 = vand.u32 4294901760, %v4465_v43 }
  0x5f   : > { %844 = vmatpush.xpose.msrb.mxu0 %v606_v19  ;;  %v323_v19 = vld [vmem:[%s4148_s14 + $0xb8] sm:$0xff]  ;;  %693 = vmatpush.xpose.msra.mxu1 %v692_v50  ;;  %5865 = vst [vmem:[#allocation7_spill] sm:$0xff] %v4481_v4  ;;  %v5824_v57 = vand.u32 4294901760, %v4481_v4 }
  0x60   : > { %1043 = vmatpush.xpose.msrb.mxu3 %v1042_v31  ;;  %570 = vmatmul.f32.vlgmr.msra.gmra.mxu0 %v4450_v26  ;;  %v4483_v31 = vand.u32 4294901760, %v462_v18  ;;  %v459_v50 = vsel %vm376_vm0, %v323_v19, 0  ;;  %v5866_v19 = vand.u32 4294901760, %v4196_v25  ;;  %v1065_v49 = vsub.f32 %v4465_v43, %v5867_v15 }
  0x61   : > { %970 = vmatpush.xpose.msrb.mxu2 %v4345_v5  ;;  %v4511_v56 = vand.u32 4294901760, %v459_v50 }
  0x62   : > { %695 = vmatmul.f32.vlgmr.msra.gmra.mxu1 %v4403_v30  ;;  %v4509_v63 = vsub.f32 %v462_v18, %v4483_v31  ;;  %v1066_v15 = vand.u32 4294901760, %v1065_v49 }
  0x63   : > { %848 = vmatpush.xpose.msrb.mxu0 %v612_v24  ;;  %919 = vmatpush.xpose.msrb.mxu1 %v4158_v8  ;;  %v350_v8 = vld [vmem:[%s5793_s1 + $0x10] sm:$0xff] }
  0x64   : > { %1049 = vmatpush.xpose.msrb.mxu3 %v1048_v60  ;;  %v384_v24 = vsel %vm376_vm0, %v350_v8, 0  ;;  %v1060_v8 = vand.u32 4294901760, %v1059_v37  ;;  %766 = vmatmul.f32.gmra.mxu2 %v4470_v14  ;;  %v1071_v37 = vsub.f32 %v4481_v4, %v5824_v57  ;;  %v5871_v57 = vand.u32 4294901760, %v4222_v39 }
  0x65   : > { %972 = vmatpush.xpose.msrb.mxu2 %v4367_v40  ;;  %v4501_v60 = vand.u32 4294901760, %v384_v24  ;;  %821 = vmatmul.f32.gmra.mxu3 %v4475_v41 }
  0x67   : > { %852 = vmatpush.xpose.msrb.mxu0 %v5866_v19  ;;  %921 = vmatpush.xpose.msrb.mxu1 %v4160_v9  ;;  %v4518_v25 = vsub.f32 %v384_v24, %v4501_v60  ;;  %v456_v9 = vsel %vm376_vm0, %v322_v38, 0  ;;  %v321_v19 = vld [vmem:[%s4148_s14 + $0xa8] sm:$0xff]  ;;  %v4535_v38 = vsub.f32 %v459_v50, %v4511_v56  ;;  %v1072_v24 = vand.u32 4294901760, %v1071_v37 }
  0x68   : > { %1055 = vmatpush.xpose.msrb.mxu3 %v1054_v2  ;;  %578 = vmatmul.f32.gmra.mxu0 %v4499_v13  ;;  %v5870_v2 = vand.u32 4294901760, %v4209_v33  ;;  %v4537_v41 = vand.u32 4294901760, %v456_v9  ;;  %v453_v33 = vsel %vm376_vm0, %v321_v19, 0  ;;  %v5872_v19 = vand.u32 4294901760, %v4509_v63 }
  0x69   : > { %5868 = vst [vmem:[#allocation8_spill] sm:$0xff] %v4518_v25  ;;  %974 = vmatpush.xpose.msrb.mxu2 %v4386_v21  ;;  %v4524_v18 = vand.u32 4294901760, %v4518_v25  ;;  %v5833_v4 = vand.u32 4294901760, %v4535_v38 }
  0x6a   : > { %699 = vmatmul.f32.gmra.mxu1 %v4452_v46  ;;  %v1077_v16 = vsub.f32 %v4509_v63, %v5872_v19 }
  0x6b   : > { %5869 = vst [vmem:[#allocation9_spill] sm:$0xff] %v4524_v18  ;;  %856 = vmatpush.xpose.msrb.mxu0 %v5870_v2  ;;  %923 = vmatpush.xpose.msrb.mxu1 %v4162_v10  ;;  %v584_v14 = vsub.f32 %v4518_v25, %v4524_v18  ;;  %v351_v10 = vld [vmem:[%s5793_s1 + $0x18] sm:$0xff]  ;;  %v320_v2 = vld [vmem:[%s4148_s14 + $0xa0] sm:$0xff] }
  0x6c   : > { %1061 = vmatpush.xpose.msrb.mxu3 %v1060_v8  ;;  %v387_v50 = vsel %vm376_vm0, %v351_v10, 0  ;;  %v4564_v10 = vand.u32 4294901760, %v453_v33  ;;  %771 = vmatmul.f32.gmra.mxu2 %v4518_v25  ;;  %v1078_v37 = vand.u32 4294901760, %v1077_v16 }
  0x6d   : > { %976 = vmatpush.xpose.msrb.mxu2 %v4414_v51  ;;  %v4549_v49 = vand.u32 4294901760, %v584_v14  ;;  %v4551_v8 = vand.u32 4294901760, %v387_v50  ;;  %827 = vmatmul.f32.gmra.mxu3 %v4524_v18  ;;  %v4562_v14 = vsub.f32 %v456_v9, %v4537_v41  ;;  %v450_v18 = vsel %vm376_vm0, %v320_v2, 0 }
  0x6e   : > { %v5875_v9 = vand.u32 4294901760, %v4229_v42  ;;  %v1083_v2 = vsub.f32 %v4535_v38, %v5833_v4  ;;  %v4587_v19 = vsub.f32 %v453_v33, %v4564_v10  ;;  %v318_v42 = vld [vmem:[%s4148_s14 + $0x90] sm:$0xff] }
  0x6f   : > { %860 = vmatpush.xpose.msrb.mxu0 %v5871_v57  ;;  %925 = vmatpush.xpose.msrb.mxu1 %v4165_v12  ;;  %v4569_v39 = vsub.f32 %v387_v50, %v4551_v8  ;;  %v319_v12 = vld [vmem:[%s4148_s14 + $0x98] sm:$0xff]  ;;  %v5834_v50 = vand.u32 4294901760, %v4562_v14 }
  0x70   : > { %1067 = vmatpush.xpose.msrb.mxu3 %v1066_v15  ;;  %586 = vmatmul.f32.gmra.mxu0 %v4549_v49  ;;  %v4580_v15 = vand.u32 4294901760, %v450_v18  ;;  %v5837_v4 = vand.u32 4294901760, %v4587_v19 }
  0x71   : > { %5873 = vst [vmem:[#allocation10_spill] sm:$0xff] %v4569_v39  ;;  %978 = vmatpush.xpose.msrb.mxu2 %v4439_v11  ;;  %v4574_v57 = vand.u32 4294901760, %v4569_v39 }
  0x72   : > { %703 = vmatmul.f32.gmra.mxu1 %v4501_v60  ;;  %v4602_v33 = vsub.f32 %v450_v18, %v4580_v15  ;;  %v5877_v18 = vand.u32 4294901760, %v4265_v61  ;;  %v353_v61 = vld [vmem:[%s5794_s2 + $0x8] sm:$0xff] }
  0x73   : > { %5874 = vst [vmem:[#allocation11_spill] sm:$0xff] %v4574_v57  ;;  %864 = vmatpush.xpose.msrb.mxu0 %v5875_v9  ;;  %927 = vmatpush.xpose.msrb.mxu1 %v4183_v20  ;;  %v592_v25 = vsub.f32 %v4569_v39, %v4574_v57  ;;  %v447_v20 = vsel %vm376_vm0, %v319_v12, 0  ;;  %v1084_v9 = vand.u32 4294901760, %v1083_v2  ;;  %v1089_v12 = vsub.f32 %v4562_v14, %v5834_v50 }
  0x74   : > { %1073 = vmatpush.xpose.msrb.mxu3 %v1072_v24  ;;  %v5876_v24 = vand.u32 4294901760, %v4250_v53  ;;  %v444_v53 = vsel %vm376_vm0, %v318_v42, 0  ;;  %776 = vmatmul.f32.gmra.mxu2 %v4569_v39 }
  0x75   : > { %980 = vmatpush.xpose.msrb.mxu2 %v4460_v32  ;;  %v4595_v16 = vand.u32 4294901760, %v592_v25  ;;  %833 = vmatmul.f32.gmra.mxu3 %v4574_v57  ;;  %v4608_v25 = vand.u32 4294901760, %v447_v20  ;;  %v1090_v2 = vand.u32 4294901760, %v1089_v12  ;;  %v4625_v42 = vand.u32 4294901760, %v444_v53 }
  0x76   : > { %v4072_v57 = vmov 0  }
  0x77   : > { %868 = vmatpush.xpose.msrb.mxu0 %v5876_v24  ;;  %929 = vmatpush.xpose.msrb.mxu1 %v4200_v28  ;;  %v317_v28 = vld [vmem:[%s4148_s14 + $0x88] sm:$0xff]  ;;  %v1095_v24 = vsub.f32 %v4587_v19, %v5837_v4  ;;  %v4623_v50 = vsub.f32 %v447_v20, %v4608_v25  ;;  %v5878_v20 = vand.u32 4294901760, %v4278_v3 }
  0x78   : > { %1079 = vmatpush.xpose.msrb.mxu3 %v1078_v37  ;;  %594 = vmatmul.f32.gmra.mxu0 %v4595_v16  ;;  %v1100_v37 = vand.u32 4294901760, %v4602_v33 }
  0x79   : > { %982 = vmatpush.xpose.msrb.mxu2 %v4483_v31  ;;  %3918 = vset.pattern.permute.xlu1 %v4072_v57  ;;  %v1106_v4 = vand.u32 4294901760, %v4623_v50 }
  0x7a   : > { %707 = vmatmul.f32.gmra.mxu1 %v4551_v8  ;;  %363 = vperm.xlu1 %3918, %v353_v61   ;;  %v1101_v12 = vsub.f32 %v4602_v33, %v1100_v37 }
  0x7b   : > { %872 = vmatpush.xpose.msrb.mxu0 %v5877_v18  ;;  %931 = vmatpush.xpose.msrb.mxu1 %v4214_v35  ;;  %v441_v35 = vsel %vm376_vm0, %v317_v28, 0  ;;  %v1096_v18 = vand.u32 4294901760, %v1095_v24  ;;  %v4642_v28 = vsub.f32 %v444_v53, %v4625_v42 }
  0x7c   : > { %1085 = vmatpush.xpose.msrb.mxu3 %v1084_v9  ;;  %v316_v9 = vld [vmem:[%s4148_s14 + $0x80] sm:$0xff]  ;;  %3917 = vset.pattern.permute.xlu0 %v4072_v57  ;;  %v4644_v39 = vand.u32 4294901760, %v441_v35  ;;  %v1102_v61 = vand.u32 4294901760, %v1101_v12 }
  0x7d   : > { %984 = vmatpush.xpose.msrb.mxu2 %v4511_v56  ;;  %3919 = vset.pattern.permute.xlu2 %v4072_v57  ;;  %v438_v3 = vsel %vm376_vm0, %v316_v9, 0  ;;  %v1112_v53 = vand.u32 4294901760, %v4642_v28 }
  0x7e   : > { %v4656_v24 = vsub.f32 %v441_v35, %v4644_v39  ;;  %v4658_v57 = vand.u32 4294901760, %v438_v3 }
  0x7f   : > { %876 = vmatpush.xpose.msrb.mxu0 %v5878_v20  ;;  %933 = vmatpush.xpose.msrb.mxu1 %v4235_v45  ;;  %v5879_v45 = vand.u32 4294901760, %v4292_v17  ;;  %v352_v17 = vld [vmem:[%s5794_s2] sm:$0xff]  ;;  %v1113_v35 = vsub.f32 %v4642_v28, %v1112_v53 }
  0x80   : > { %1091 = vmatpush.xpose.msrb.mxu3 %v1090_v2  ;;  %v1107_v2 = vsub.f32 %v4623_v50, %v1106_v4  ;;  %v1118_v20 = vand.u32 4294901760, %v4656_v24  ;;  %v4672_v12 = vsub.f32 %v438_v3, %v4658_v57  ;;  %v5882_v3 = vand.u32 4294901760, %v4341_v1  ;;  %v355_v1 = vld [vmem:[%s5794_s2 + $0x18] sm:$0xff] }
  0x81   : > { %986 = vmatpush.xpose.msrb.mxu2 %v4537_v41  ;;  %373 = vperm.xlu0 %3917, %v355_v1  }
  0x82   : > { %358 = vperm.xlu1 %3918, %v352_v17   ;;  %v1108_v9 = vand.u32 4294901760, %v1107_v2 }
  0x83   : > { %880 = vmatpush.xpose.msrb.mxu0 %v5879_v45  ;;  %935 = vmatpush.xpose.msrb.mxu1 %v4247_v52  ;;  %v5880_v52 = vand.u32 4294901760, %v4299_v23  ;;  %v1119_v23 = vsub.f32 %v4656_v24, %v1118_v20  ;;  %v1124_v45 = vand.u32 4294901760, %v4672_v12 }
  0x84   : > { %1097 = vmatpush.xpose.msrb.mxu3 %v1096_v18  ;;  %v5881_v18 = vand.u32 4294901760, %v4323_v48 }
  0x85   : > { %988 = vmatpush.xpose.msrb.mxu2 %v4564_v10  ;;  %v1120_v48 = vand.u32 4294901760, %v1119_v23 }
  0x87   : > { %884 = vmatpush.xpose.msrb.mxu0 %v5880_v52  ;;  %937 = vmatpush.xpose.msrb.mxu1 %v4261_v59  ;;  %v1114_v59 = vand.u32 4294901760, %v1113_v35  ;;  %v341_v35 = vld [vmem:[%s4148_s14 + $0x148] sm:$0xff] }
  0x88   : > { %1103 = vmatpush.xpose.msrb.mxu3 %v1102_v61  ;;  %v5883_v61 = vand.u32 4294901760, %v4361_v34  ;;  %v5891_v34 = vld [vmem:[#allocation7_spill] sm:$0xff] }
  0x89   : > { %990 = vmatpush.xpose.msrb.mxu2 %v4580_v15 }
  0x8b   : > { %888 = vmatpush.xpose.msrb.mxu0 %v5881_v18  ;;  %939 = vmatpush.xpose.msrb.mxu1 %v4270_v0  ;;  %v1125_v0 = vsub.f32 %v4672_v12, %v1124_v45 }
  0x8c   : > { %1109 = vmatpush.xpose.msrb.mxu3 %v1108_v9 }
  0x8d   : > { %992 = vmatpush.xpose.msrb.mxu2 %v4608_v25  ;;  %v1126_v2 = vand.u32 4294901760, %v1125_v0 }
  0x8f   : > { %892 = vmatpush.xpose.msrb.mxu0 %v5882_v3  ;;  %941 = vmatpush.xpose.msrb.mxu1 %v4284_v6  ;;  %v5884_v6 = vand.u32 4294901760, %v4378_v55  ;;  %v5895_v55 = vand.u32 4294901760, %v4562_v14  ;;  %v5898_v3 = vld [vmem:[#allocation4_spill] sm:$0xff] }
  0x90   : > { %1115 = vmatpush.xpose.msrb.mxu3 %v1114_v59 }
  0x91   : > { %994 = vmatpush.xpose.msrb.mxu2 %v4625_v42 }
  0x93   : > { %896 = vmatpush.xpose.msrb.mxu0 %v5883_v61  ;;  %943 = vmatpush.xpose.msrb.mxu1 %v4305_v29  ;;  %v5885_v29 = vand.u32 4294901760, %v4349_v7 }
  0x94   : > { %1121 = vmatpush.xpose.msrb.mxu3 %v1120_v48  ;;  %v5899_v48 = vld [vmem:[#allocation5_spill] sm:$0xff] }
  0x95   : > { %996 = vmatpush.xpose.msrb.mxu2 %v4644_v39 }
  0x97   : > { %900 = vmatpush.xpose.msrb.mxu0 %v5884_v6  ;;  %945 = vmatpush.xpose.msrb.mxu1 %v4320_v47  ;;  %v354_v47 = vld [vmem:[%s5794_s2 + $0x10] sm:$0xff] }
  0x98   : > { %1127 = vmatpush.xpose.msrb.mxu3 %v1126_v2  ;;  %368 = vperm.xlu0 %3917, %v354_v47   ;;  %v1852_v47 = vld [vmem:[%s5796_s4 + $0x8] sm:$0xff] }
  0x99   : > { %998 = vmatpush.xpose.msrb.mxu2 %v4658_v57 }
  0x9a   : > { %902 = vmatmul.f32.vlgmr.msrb.gmra.mxu0 %v4403_v30 }
  0x9b   : > { %1147 = vmatpush.xpose.msra.mxu0 %v4349_v7  ;;  %947 = vmatpush.xpose.msrb.mxu1 %v4337_v62  ;;  %v5886_v7 = vand.u32 4294901760, %v4365_v36  ;;  %v5887_v62 = vand.u32 4294901760, %v4384_v58 }
  0x9c   : > { %1353 = vmatpush.xpose.msra.mxu3 %v4329_v54  ;;  %1004 = vmatmul.f32.vlgmr.msrb.gmra.mxu2 %v4450_v26 }
  0x9d   : > { %1274 = vmatpush.xpose.msra.mxu2 %v5885_v29  ;;  %1129 = vmatmul.f32.vlgmr.msrb.gmra.mxu3 %v4403_v30 }
  0x9f   : > { %1150 = vmatpush.xpose.msra.mxu0 %v4365_v36  ;;  %949 = vmatpush.xpose.msrb.mxu1 %v4357_v27  ;;  %v5889_v27 = vand.u32 4294901760, %v4437_v22  ;;  %v5892_v36 = vand.u32 4294901760, %v5891_v34 }
  0xa0   : > { %1355 = vmatpush.xpose.msra.mxu3 %v4345_v5  ;;  %1862 = vperm.xlu0 %3917, %v1852_v47   ;;  %v335_v47 = vld [vmem:[%s4148_s14 + $0x118] sm:$0xff] }
  0xa1   : > { %1278 = vmatpush.xpose.msra.mxu2 %v5886_v7  ;;  %v339_v7 = vld [vmem:[%s4148_s14 + $0x138] sm:$0xff] }
  0xa2   : > { %951 = vmatmul.f32.vlgmr.msrb.gmra.mxu1 %v4403_v30  ;;  %906 = vmatmul.f32.gmra.mxu0 %v4452_v46 }
  0xa3   : > { %1153 = vmatpush.xpose.msra.mxu0 %v4384_v58  ;;  %1215 = vmatpush.xpose.msra.mxu1 %v4329_v54  ;;  %v5888_v54 = vand.u32 4294901760, %v4411_v44  ;;  %v347_v58 = vld [vmem:[%s4148_s14 + $0x178] sm:$0xff] }
  0xa4   : > { %1357 = vmatpush.xpose.msra.mxu3 %v4367_v40  ;;  %1012 = vmatmul.f32.gmra.mxu2 %v4499_v13 }
  0xa5   : > { %1282 = vmatpush.xpose.msra.mxu2 %v5887_v62  ;;  %1133 = vmatmul.f32.gmra.mxu3 %v4452_v46 }
  0xa7   : > { %1156 = vmatpush.xpose.msra.mxu0 %v4411_v44  ;;  %1217 = vmatpush.xpose.msra.mxu1 %v4345_v5  ;;  %v5890_v5 = vand.u32 4294901760, %v4465_v43  ;;  %v346_v44 = vld [vmem:[%s4148_s14 + $0x170] sm:$0xff] }
  0xa8   : > { %1359 = vmatpush.xpose.msra.mxu3 %v4386_v21 }
  0xa9   : > { %1286 = vmatpush.xpose.msra.mxu2 %v5888_v54 }
  0xaa   : > { %955 = vmatmul.f32.gmra.mxu1 %v4452_v46  ;;  %910 = vmatmul.f32.gmra.mxu0 %v4501_v60 }
  0xab   : > { %1159 = vmatpush.xpose.msra.mxu0 %v4437_v22  ;;  %1219 = vmatpush.xpose.msra.mxu1 %v4367_v40  ;;  %v5893_v40 = vand.u32 4294901760, %v4509_v63  ;;  %v528_v22 = vsel %vm376_vm0, %v346_v44, 0 }
  0xac   : > { %1361 = vmatpush.xpose.msra.mxu3 %v4414_v51  ;;  %1020 = vmatmul.f32.gmra.mxu2 %v4549_v49 }
  0xad   : > { %1290 = vmatpush.xpose.msra.mxu2 %v5889_v27  ;;  %1137 = vmatmul.f32.gmra.mxu3 %v4501_v60 }
  0xaf   : > { %1162 = vmatpush.xpose.msra.mxu0 %v4465_v43  ;;  %1221 = vmatpush.xpose.msra.mxu1 %v4386_v21  ;;  %v531_v21 = vsel %vm376_vm0, %v347_v58, 0  ;;  %v4794_v43 = vand.u32 4294901760, %v528_v22 }
  0xb0   : > { %1363 = vmatpush.xpose.msra.mxu3 %v4439_v11 }
  0xb1   : > { %1294 = vmatpush.xpose.msra.mxu2 %v5890_v5 }
  0xb2   : > { %959 = vmatmul.f32.gmra.mxu1 %v4501_v60  ;;  %914 = vmatmul.f32.gmra.mxu0 %v4551_v8 }
  0xb3   : > { %1165 = vmatpush.xpose.msra.mxu0 %v5891_v34  ;;  %1223 = vmatpush.xpose.msra.mxu1 %v4414_v51  ;;  %v5894_v51 = vand.u32 4294901760, %v4535_v38 }
  0xb4   : > { %1365 = vmatpush.xpose.msra.mxu3 %v4460_v32  ;;  %1028 = vmatmul.f32.gmra.mxu2 %v4595_v16 }
  0xb5   : > { %1298 = vmatpush.xpose.msra.mxu2 %v5892_v36  ;;  %1141 = vmatmul.f32.gmra.mxu3 %v4551_v8  ;;  %v1851_v36 = vld [vmem:[%s5796_s4] sm:$0xff] }
  0xb6   : > { %1857 = vperm.xlu1 %3918, %v1851_v36  }
  0xb7   : > { %1168 = vmatpush.xpose.msra.mxu0 %v4509_v63  ;;  %1225 = vmatpush.xpose.msra.mxu1 %v4439_v11  ;;  %v4786_v63 = vand.u32 4294901760, %v531_v21  ;;  %v345_v11 = vld [vmem:[%s4148_s14 + $0x168] sm:$0xff] }
  0xb8   : > { %1367 = vmatpush.xpose.msra.mxu3 %v4483_v31 }
  0xb9   : > { %1302 = vmatpush.xpose.msra.mxu2 %v5893_v40  ;;  %v507_v40 = vsel %vm376_vm0, %v339_v7, 0 }
  0xba   : > { %963 = vmatmul.f32.gmra.mxu1 %v4551_v8 }
  0xbb   : > { %1171 = vmatpush.xpose.msra.mxu0 %v4535_v38  ;;  %1227 = vmatpush.xpose.msra.mxu1 %v4460_v32  ;;  %v5896_v32 = vand.u32 4294901760, %v4587_v19  ;;  %v4809_v38 = vsub.f32 %v528_v22, %v4794_v43 }
  0xbc   : > { %1369 = vmatpush.xpose.msra.mxu3 %v4511_v56 }
  0xbd   : > { %1306 = vmatpush.xpose.msra.mxu2 %v5894_v51  ;;  %v5900_v51 = vld [vmem:[#allocation6_spill] sm:$0xff] }
  0xbf   : > { %1174 = vmatpush.xpose.msra.mxu0 %v4562_v14  ;;  %1229 = vmatpush.xpose.msra.mxu1 %v4483_v31  ;;  %v525_v31 = vsel %vm376_vm0, %v345_v11, 0  ;;  %v4918_v11 = vand.u32 4294901760, %v507_v40 }
  0xc0   : > { %1371 = vmatpush.xpose.msra.mxu3 %v4537_v41 }
  0xc1   : > { %1310 = vmatpush.xpose.msra.mxu2 %v5895_v55  ;;  %v338_v55 = vld [vmem:[%s4148_s14 + $0x130] sm:$0xff] }
  0xc3   : > { %1177 = vmatpush.xpose.msra.mxu0 %v4587_v19  ;;  %1231 = vmatpush.xpose.msra.mxu1 %v4511_v56  ;;  %v344_v56 = vld [vmem:[%s4148_s14 + $0x160] sm:$0xff] }
  0xc4   : > { %1373 = vmatpush.xpose.msra.mxu3 %v4564_v10 }
  0xc5   : > { %1314 = vmatpush.xpose.msra.mxu2 %v5896_v32  ;;  %v5901_v32 = vld [vmem:[#allocation8_spill] sm:$0xff] }
  0xc7   : > { %1180 = vmatpush.xpose.msra.mxu0 %v4602_v33  ;;  %1233 = vmatpush.xpose.msra.mxu1 %v4537_v41  ;;  %v4798_v41 = vsub.f32 %v531_v21, %v4786_v63 }
  0xc8   : > { %1375 = vmatpush.xpose.msra.mxu3 %v4580_v15 }
  0xc9   : > { %1318 = vmatpush.xpose.msra.mxu2 %v1100_v37  ;;  %v5853_v14 = vand.u32 4294901760, %v4798_v41 }
  0xcb   : > { %1183 = vmatpush.xpose.msra.mxu0 %v4623_v50  ;;  %1235 = vmatpush.xpose.msra.mxu1 %v4564_v10  ;;  %v522_v10 = vsel %vm376_vm0, %v344_v56, 0  ;;  %v5852_v50 = vand.u32 4294901760, %v4809_v38  ;;  %v1469_v33 = vsub.f32 %v4798_v41, %v5853_v14  ;;  %v337_v56 = vld [vmem:[%s4148_s14 + $0x128] sm:$0xff] }
  0xcc   : > { %1377 = vmatpush.xpose.msra.mxu3 %v4608_v25 }
  0xcd   : > { %1322 = vmatpush.xpose.msra.mxu2 %v1106_v4  ;;  %v4806_v4 = vand.u32 4294901760, %v525_v31  ;;  %v1470_v17 = vand.u32 4294901760, %v1469_v33 }
  0xcf   : > { %1186 = vmatpush.xpose.msra.mxu0 %v4642_v28  ;;  %1237 = vmatpush.xpose.msra.mxu1 %v4580_v15  ;;  %v343_v15 = vld [vmem:[%s4148_s14 + $0x158] sm:$0xff]  ;;  %v4821_v19 = vsub.f32 %v525_v31, %v4806_v4  ;;  %v342_v28 = vld [vmem:[%s4148_s14 + $0x150] sm:$0xff]  ;;  %v504_v31 = vsel %vm376_vm0, %v338_v55, 0  ;;  %v495_v55 = vsel %vm376_vm0, %v335_v47, 0 }
  0xd0   : > { %1379 = vmatpush.xpose.msra.mxu3 %v4625_v42  ;;  %v519_v37 = vsel %vm376_vm0, %v343_v15, 0 }
  0xd1   : > { %1326 = vmatpush.xpose.msra.mxu2 %v1112_v53  ;;  %v1475_v53 = vsub.f32 %v4809_v38, %v5852_v50  ;;  %v4845_v52 = vand.u32 4294901760, %v519_v37 }
  0xd3   : > { %1189 = vmatpush.xpose.msra.mxu0 %v4656_v24  ;;  %1239 = vmatpush.xpose.msra.mxu1 %v4608_v25  ;;  %v4828_v25 = vand.u32 4294901760, %v522_v10  ;;  %v5850_v24 = vand.u32 4294901760, %v4821_v19  ;;  %v4863_v23 = vsub.f32 %v519_v37, %v4845_v52  ;;  %v4930_v37 = vand.u32 4294901760, %v504_v31 }
  0xd4   : > { %1381 = vmatpush.xpose.msra.mxu3 %v4644_v39 }
  0xd5   : > { %1330 = vmatpush.xpose.msra.mxu2 %v1118_v20  ;;  %v4848_v9 = vsub.f32 %v522_v10, %v4828_v25  ;;  %v1476_v20 = vand.u32 4294901760, %v1475_v53  ;;  %v5847_v1 = vand.u32 4294901760, %v4863_v23  ;;  %v501_v53 = vsel %vm376_vm0, %v337_v56, 0 }
  0xd7   : > { %1192 = vmatpush.xpose.msra.mxu0 %v4672_v12  ;;  %1241 = vmatpush.xpose.msra.mxu1 %v4625_v42  ;;  %v5897_v42 = vld [vmem:[#allocation3_spill] sm:$0xff]  ;;  %v1481_v12 = vsub.f32 %v4821_v19, %v5850_v24  ;;  %v5848_v59 = vand.u32 4294901760, %v4848_v9  ;;  %v1493_v5 = vsub.f32 %v4863_v23, %v5847_v1 }
  0xd8   : > { %1383 = vmatpush.xpose.msra.mxu3 %v4658_v57 }
  0xd9   : > { %1334 = vmatpush.xpose.msra.mxu2 %v1124_v45  ;;  %v513_v45 = vsel %vm376_vm0, %v341_v35, 0  ;;  %v1482_v0 = vand.u32 4294901760, %v1481_v12  ;;  %v1487_v2 = vsub.f32 %v4848_v9, %v5848_v59  ;;  %v1494_v44 = vand.u32 4294901760, %v1493_v5 }
  0xda   : > { %1195 = vmatmul.f32.vlgmr.msra.gmra.mxu0 %v5897_v42  ;;  %v4872_v61 = vand.u32 4294901760, %v513_v45 }
  0xdb   : > { %1402 = vmatpush.xpose.msrb.mxu0 %v4786_v63  ;;  %1243 = vmatpush.xpose.msra.mxu1 %v4644_v39  ;;  %v516_v39 = vsel %vm376_vm0, %v342_v28, 0  ;;  %v1488_v27 = vand.u32 4294901760, %v1487_v2  ;;  %v4933_v28 = vsub.f32 %v507_v40, %v4918_v11  ;;  %v4952_v2 = vsub.f32 %v504_v31, %v4930_v37  ;;  %v334_v31 = vld [vmem:[%s4148_s14 + $0x110] sm:$0xff] }
  0xdc   : > { %1649 = vmatpush.xpose.msrb.mxu3 %v4786_v63  ;;  %1336 = vmatmul.f32.vlgmr.msra.gmra.mxu2 %v4403_v30  ;;  %v4859_v18 = vand.u32 4294901760, %v516_v39  ;;  %v4893_v54 = vsub.f32 %v513_v45, %v4872_v61 }
  0xdd   : > { %1581 = vmatpush.xpose.msrb.mxu2 %v4798_v41  ;;  %1385 = vmatmul.f32.vlgmr.msra.gmra.mxu3 %v4403_v30  ;;  %v4940_v35 = vpop.f32.mrf.mxu0  ;;  %v5840_v36 = vand.u32 4294901760, %v4952_v2 }
  0xde   : > { %v4880_v6 = vsub.f32 %v516_v39, %v4859_v18  ;;  %v5844_v58 = vand.u32 4294901760, %v4893_v54  ;;  %v5902_v39 = vld [vmem:[#allocation9_spill] sm:$0xff] }
  0xdf   : > { %1404 = vmatpush.xpose.msrb.mxu0 %v4794_v43  ;;  %1245 = vmatpush.xpose.msra.mxu1 %v4658_v57  ;;  %v340_v57 = vld [vmem:[%s4148_s14 + $0x140] sm:$0xff]  ;;  %v762_v24 = vpop.f32.mrf.mxu2 }
  0xe0   : > { %1651 = vmatpush.xpose.msrb.mxu3 %v4794_v43  ;;  %v510_v29 = vsel %vm376_vm0, %v340_v57, 0  ;;  %v5845_v34 = vand.u32 4294901760, %v4880_v6  ;;  %v1505_v10 = vsub.f32 %v4893_v54, %v5844_v58  ;;  %v4948_v57 = vand.u32 4294901760, %v501_v53  ;;  %v5048_v14 = vpop.f32.mrf.mxu3 }
  0xe1   : > { %1584 = vmatpush.xpose.msrb.mxu2 %v4809_v38  ;;  %v4890_v62 = vand.u32 4294901760, %v510_v29 }
  0xe2   : > { %1249 = vmatmul.f32.vlgmr.msra.gmra.mxu1 %v5898_v3  ;;  %1200 = vmatmul.f32.gmra.mxu0 %v5899_v48  ;;  %v1499_v22 = vsub.f32 %v4880_v6, %v5845_v34  ;;  %v1506_v12 = vand.u32 4294901760, %v1505_v10  ;;  %v4967_v40 = vsub.f32 %v501_v53, %v4948_v57 }
  0xe3   : > { %1406 = vmatpush.xpose.msrb.mxu0 %v4806_v4  ;;  %1471 = vmatpush.xpose.msrb.mxu1 %v1470_v17  ;;  %v4912_v21 = vsub.f32 %v510_v29, %v4890_v62  ;;  %v336_v17 = vld [vmem:[%s4148_s14 + $0x120] sm:$0xff] }
  0xe4   : > { %1653 = vmatpush.xpose.msrb.mxu3 %v4806_v4  ;;  %1340 = vmatmul.f32.gmra.mxu2 %v4452_v46  ;;  %v1500_v33 = vand.u32 4294901760, %v1499_v22  ;;  %v498_v29 = vsel %vm376_vm0, %v336_v17, 0  ;;  %v4973_v22 = vpop.f32.mrf.mxu1  ;;  %v4985_v17 = vand.u32 4294901760, %v495_v55 }
  0xe5   : > { %1587 = vmatpush.xpose.msrb.mxu2 %v4821_v19  ;;  %1389 = vmatmul.f32.gmra.mxu3 %v4452_v46  ;;  %v5842_v15 = vand.u32 4294901760, %v4912_v21  ;;  %v4959_v7 = vand.u32 4294901760, %v498_v29  ;;  %v4983_v53 = vpop.f32.mrf.mxu0 }
  0xe6   : > { %5905 = vst [vmem:[#allocation7_spill] sm:$0xff] %v4985_v17 }
  0xe7   : > { %1408 = vmatpush.xpose.msrb.mxu0 %v4828_v25  ;;  %1477 = vmatpush.xpose.msrb.mxu1 %v1476_v20  ;;  %v5903_v20 = vld [vmem:[#allocation10_spill] sm:$0xff]  ;;  %v1511_v45 = vsub.f32 %v4912_v21, %v5842_v15  ;;  %v4977_v56 = vsub.f32 %v498_v29, %v4959_v7  ;;  %v333_v29 = vld [vmem:[%s4148_s14 + $0x108] sm:$0xff]  ;;  %v332_v15 = vld [vmem:[%s4148_s14 + $0x100] sm:$0xff]  ;;  %s3761_s14 = smul.u32 12, %s278_s18 }
  0xe8   : > { %1655 = vmatpush.xpose.msrb.mxu3 %v4828_v25 }
  0xe9   : > { %1590 = vmatpush.xpose.msrb.mxu2 %v4848_v9  ;;  %v5846_v47 = vand.u32 4294901760, %v4977_v56  ;;  %s5493_s19 = scalar_lea.vmem [#allocation2], %s3761_s14  }
  0xea   : > { %1255 = vmatmul.f32.gmra.mxu1 %v5900_v51  ;;  %1205 = vmatmul.f32.gmra.mxu0 %v5901_v32 }
  0xeb   : > { %1410 = vmatpush.xpose.msrb.mxu0 %v4845_v52  ;;  %1483 = vmatpush.xpose.msrb.mxu1 %v1482_v0  ;;  %v5841_v0 = vand.u32 4294901760, %v4933_v28 }
  0xec   : > { %1657 = vmatpush.xpose.msrb.mxu3 %v4845_v52  ;;  %1344 = vmatmul.f32.gmra.mxu2 %v4501_v60 }
  0xed   : > { %1593 = vmatpush.xpose.msrb.mxu2 %v4863_v23  ;;  %1393 = vmatmul.f32.gmra.mxu3 %v4501_v60  ;;  %v1517_v5 = vsub.f32 %v4933_v28, %v5841_v0  ;;  %v5000_v0 = vsub.f32 %v495_v55, %v4985_v17 }
  0xef   : > { %1412 = vmatpush.xpose.msrb.mxu0 %v4859_v18  ;;  %1489 = vmatpush.xpose.msrb.mxu1 %v1488_v27  ;;  %v1512_v27 = vand.u32 4294901760, %v1511_v45  ;;  %v1518_v10 = vand.u32 4294901760, %v1517_v5  ;;  %v492_v45 = vsel %vm376_vm0, %v334_v31, 0  ;;  %v489_v31 = vsel %vm376_vm0, %v333_v29, 0 }
  0xf0   : > { %1659 = vmatpush.xpose.msrb.mxu3 %v4859_v18  ;;  %v5012_v58 = vand.u32 4294901760, %v489_v31  ;;  %v5849_v55 = vand.u32 4294901760, %v5000_v0  ;;  %v486_v29 = vsel %vm376_vm0, %v332_v15, 0 }
  0xf1   : > { %1596 = vmatpush.xpose.msrb.mxu2 %v4880_v6 }
  0xf2   : > { %1261 = vmatmul.f32.gmra.mxu1 %v5902_v39  ;;  %1210 = vmatmul.f32.gmra.mxu0 %v5903_v20  ;;  %5907 = vst [vmem:[#allocation4_spill] sm:$0xff] %v5012_v58  ;;  %v5029_v59 = vsub.f32 %v489_v31, %v5012_v58 }
  0xf3   : > { %1414 = vmatpush.xpose.msrb.mxu0 %v4872_v61  ;;  %1495 = vmatpush.xpose.msrb.mxu1 %v1494_v44  ;;  %v5904_v44 = vld [vmem:[#allocation11_spill] sm:$0xff] }
  0xf4   : > { %1661 = vmatpush.xpose.msrb.mxu3 %v4872_v61  ;;  %1348 = vmatmul.f32.gmra.mxu2 %v4551_v8 }
  0xf5   : > { %1599 = vmatpush.xpose.msrb.mxu2 %v4893_v54  ;;  %1397 = vmatmul.f32.gmra.mxu3 %v4551_v8 }
  0xf7   : > { %1416 = vmatpush.xpose.msrb.mxu0 %v4890_v62  ;;  %1501 = vmatpush.xpose.msrb.mxu1 %v1500_v33  ;;  %v1523_v33 = vsub.f32 %v4952_v2, %v5840_v36  ;;  %v4997_v36 = vand.u32 4294901760, %v492_v45 }
  0xf8   : > { %1663 = vmatpush.xpose.msrb.mxu3 %v4890_v62 }
  0xf9   : > { %1602 = vmatpush.xpose.msrb.mxu2 %v4912_v21  ;;  %5906 = vst [vmem:[#allocation3_spill] sm:$0xff] %v4997_v36  ;;  %v5016_v34 = vsub.f32 %v492_v45, %v4997_v36 }
  0xfa   : > { %1267 = vmatmul.f32.gmra.mxu1 %v5904_v44 }
  0xfb   : > { %1418 = vmatpush.xpose.msrb.mxu0 %v4918_v11  ;;  %1507 = vmatpush.xpose.msrb.mxu1 %v1506_v12  ;;  %v5843_v12 = vand.u32 4294901760, %v4967_v40  ;;  %v5851_v45 = vand.u32 4294901760, %v5016_v34 }
  0xfc   : > { %1665 = vmatpush.xpose.msrb.mxu3 %v4918_v11 }
  0xfd   : > { %1605 = vmatpush.xpose.msrb.mxu2 %v4933_v28  ;;  %v1529_v5 = vsub.f32 %v4967_v40, %v5843_v12  ;;  %v5010_v12 = vpop.f32.mrf.mxu1 }
  0xff   : > { %1420 = vmatpush.xpose.msrb.mxu0 %v4930_v37  ;;  %1513 = vmatpush.xpose.msrb.mxu1 %v1512_v27  ;;  %v1524_v27 = vand.u32 4294901760, %v1523_v33  ;;  %v1530_v33 = vand.u32 4294901760, %v1529_v5  ;;  %v5025_v5 = vand.u32 4294901760, %v486_v29 }
 0x100   : > { %1667 = vmatpush.xpose.msrb.mxu3 %v4930_v37 }
 0x101   : > { %1608 = vmatpush.xpose.msrb.mxu2 %v4952_v2  ;;  %5908 = vst [vmem:[#allocation5_spill] sm:$0xff] %v5025_v5 }
 0x103   : > { %1422 = vmatpush.xpose.msrb.mxu0 %v4948_v57  ;;  %1519 = vmatpush.xpose.msrb.mxu1 %v1518_v10  ;;  %v1535_v10 = vsub.f32 %v4977_v56, %v5846_v47  ;;  %v587_v47 = vpop.f32.mrf.mxu0 }
 0x104   : > { %1669 = vmatpush.xpose.msrb.mxu3 %v4948_v57 }
 0x105   : > { %1611 = vmatpush.xpose.msrb.mxu2 %v4967_v40  ;;  %v1536_v1 = vand.u32 4294901760, %v1535_v10  ;;  %v1547_v10 = vsub.f32 %v5016_v34, %v5851_v45  ;;  %v704_v31 = vpop.f32.mrf.mxu1 }
 0x107   : > { %1424 = vmatpush.xpose.msrb.mxu0 %v4959_v7  ;;  %1525 = vmatpush.xpose.msrb.mxu1 %v1524_v27  ;;  %v1541_v27 = vsub.f32 %v5000_v0, %v5849_v55  ;;  %v5039_v55 = vsub.f32 %v486_v29, %v5025_v5  ;;  %v5052_v29 = vpop.permute.xlu0 %373 }
 0x108   : > { %1671 = vmatpush.xpose.msrb.mxu3 %v4959_v7 }
 0x109   : > { %1614 = vmatpush.xpose.msrb.mxu2 %v4977_v56  ;;  %v1542_v15 = vand.u32 4294901760, %v1541_v27  ;;  %v5858_v50 = vand.u32 4294901760, %v5039_v55 }
 0x10b   : > { %1426 = vmatpush.xpose.msrb.mxu0 %v4985_v17  ;;  %1531 = vmatpush.xpose.msrb.mxu1 %v1530_v33  ;;  %v5855_v33 = vand.u32 4294901760, %v5029_v59  ;;  %v595_v27 = vpop.f32.mrf.mxu0 }
 0x10c   : > { %1673 = vmatpush.xpose.msrb.mxu3 %v4985_v17 }
 0x10d   : > { %1617 = vmatpush.xpose.msrb.mxu2 %v5000_v0  ;;  %v1553_v45 = vsub.f32 %v5029_v59, %v5855_v33  ;;  %v5909_v33 = vand.u32 4294901760, %v4798_v41  ;;  %v822_v41 = vpop.f32.mrf.mxu3 }
 0x10f   : > { %1428 = vmatpush.xpose.msrb.mxu0 %v4997_v36  ;;  %1537 = vmatpush.xpose.msrb.mxu1 %v1536_v1  ;;  %v1548_v1 = vand.u32 4294901760, %v1547_v10  ;;  %v1559_v10 = vsub.f32 %v5039_v55, %v5858_v50 }
 0x110   : > { %1675 = vmatpush.xpose.msrb.mxu3 %v4997_v36  ;;  %v5058_v36 = vpop.permute.xlu1 %363 }
 0x111   : > { %1620 = vmatpush.xpose.msrb.mxu2 %v5016_v34  ;;  %v1560_v17 = vand.u32 4294901760, %v1559_v10 }
 0x113   : > { %1430 = vmatpush.xpose.msrb.mxu0 %v5012_v58  ;;  %1543 = vmatpush.xpose.msrb.mxu1 %v1542_v15  ;;  %v1554_v15 = vand.u32 4294901760, %v1553_v45  ;;  %v767_v45 = vpop.f32.mrf.mxu2 }
 0x114   : > { %1677 = vmatpush.xpose.msrb.mxu3 %v5012_v58  ;;  %v708_v58 = vpop.f32.mrf.mxu1 }
 0x115   : > { %1623 = vmatpush.xpose.msrb.mxu2 %v5029_v59 }
 0x117   : > { %1432 = vmatpush.xpose.msrb.mxu0 %v5025_v5  ;;  %1549 = vmatpush.xpose.msrb.mxu1 %v1548_v1  ;;  %v5910_v1 = vand.u32 4294901760, %v4809_v38  ;;  %v903_v50 = vpop.f32.mrf.mxu0 }
 0x118   : > { %1679 = vmatpush.xpose.msrb.mxu3 %v5025_v5  ;;  %v5911_v5 = vand.u32 4294901760, %v4821_v19 }
 0x119   : > { %1626 = vmatpush.xpose.msrb.mxu2 %v5039_v55 }
 0x11a   : > { %1438 = vmatmul.f32.vlgmr.msrb.gmra.mxu0 %v4450_v26  ;;  %v580_v26 = vadd.f32 %v4983_v53, %v5058_v36 }
 0x11b   : > { %1708 = vmatpush.xpose.msra.mxu0 %v5909_v33  ;;  %1555 = vmatpush.xpose.msrb.mxu1 %v1554_v15  ;;  %v5069_v33 = vpop.permute.xlu0 %368  ;;  %v772_v53 = vpop.f32.mrf.mxu2 }
 0x11c   : > { %1683 = vmatmul.f32.vlgmr.msrb.gmra.mxu3 %v5898_v3  ;;  %1629 = vmatmul.f32.vlgmr.msrb.gmra.mxu2 %v5897_v42  ;;  %v5076_v3 = vpop.permute.xlu1 %358  ;;  %v588_v38 = vadd.f32 %v587_v47, %v5069_v33  ;;  %v5912_v42 = vand.u32 4294901760, %v4848_v9  ;;  %v828_v15 = vpop.f32.mrf.mxu3  ;;  %v5913_v47 = vand.u32 4294901760, %v4863_v23 }
 0x11f   : > { %1712 = vmatpush.xpose.msra.mxu0 %v5910_v1  ;;  %1561 = vmatpush.xpose.msrb.mxu1 %v1560_v17  ;;  %v952_v19 = vpop.f32.mrf.mxu1  ;;  %v907_v17 = vpop.f32.mrf.mxu0 }
 0x122   : > { %1446 = vmatmul.f32.gmra.mxu0 %v4499_v13  ;;  %1563 = vmatmul.f32.vlgmr.msrb.gmra.mxu1 %v4403_v30  ;;  %v701_v13 = vadd.f32 %v5010_v12, %v580_v26 }
 0x123   : > { %1716 = vmatpush.xpose.msra.mxu0 %v5911_v5  ;;  %1787 = vmatpush.xpose.msra.mxu1 %v4786_v63  ;;  %v572_v63 = vadd.f32 %v4940_v35, %v5076_v3  ;;  %v705_v5 = vadd.f32 %v704_v31, %v588_v38  ;;  %v5914_v35 = vand.u32 4294901760, %v4880_v6  ;;  %v777_v10 = vpop.f32.mrf.mxu2 }
 0x124   : > { %1689 = vmatmul.f32.gmra.mxu3 %v5900_v51  ;;  %1634 = vmatmul.f32.gmra.mxu2 %v5899_v48  ;;  %v596_v48 = vadd.f32 %v595_v27, %v5052_v29  ;;  %v834_v6 = vpop.f32.mrf.mxu3 }
 0x125   : > { %v697_v9 = vadd.f32 %v4973_v22, %v572_v63  ;;  %v773_v51 = vadd.f32 %v772_v53, %v705_v5  ;;  %v1848_v53 = vld [vmem:[%s5795_s3 + $0x8] sm:$0xff] }
 0x127   : > { %1720 = vmatpush.xpose.msra.mxu0 %v5912_v42  ;;  %1789 = vmatpush.xpose.msra.mxu1 %v4794_v43  ;;  %v768_v43 = vadd.f32 %v767_v45, %v701_v13  ;;  %v763_v23 = vadd.f32 %v762_v24, %v697_v9  ;;  %v956_v12 = vpop.f32.mrf.mxu1  ;;  %v911_v22 = vpop.f32.mrf.mxu0  ;;  %v829_v31 = vadd.f32 %v828_v15, %v773_v51  ;;  %v5915_v45 = vand.u32 4294901760, %v4893_v54 }
 0x128   : > { %v5916_v54 = vand.u32 4294901760, %v4912_v21 }
 0x12a   : > { %1454 = vmatmul.f32.gmra.mxu0 %v4549_v49  ;;  %1567 = vmatmul.f32.gmra.mxu1 %v4452_v46  ;;  %v709_v49 = vadd.f32 %v708_v58, %v596_v48  ;;  %v5919_v48 = vand.u32 4294901760, %v4967_v40 }
 0x12b   : > { %1724 = vmatpush.xpose.msra.mxu0 %v5913_v47  ;;  %1791 = vmatpush.xpose.msra.mxu1 %v4806_v4  ;;  %v823_v4 = vadd.f32 %v822_v41, %v768_v43 }
 0x12c   : > { %1695 = vmatmul.f32.gmra.mxu3 %v5902_v39  ;;  %1639 = vmatmul.f32.gmra.mxu2 %v5901_v32  ;;  %v817_v39 = vadd.f32 %v5048_v14, %v763_v23  ;;  %v912_v32 = vadd.f32 %v911_v22, %v829_v31  ;;  %v778_v58 = vadd.f32 %v777_v10, %v709_v49  ;;  %v5121_v21 = vpop.f32.mrf.mxu3  ;;  %v5920_v22 = vand.u32 4294901760, %v4977_v56 }
 0x12d   : > { %v908_v24 = vadd.f32 %v907_v17, %v823_v4  ;;  %v1880_v17 = vsel %vm1875_vm1, %v1848_v53, 0  ;;  %v5921_v56 = vand.u32 4294901760, %v5000_v0  ;;  %v1850_v0 = vld [vmem:[%s5795_s3 + $0x18] sm:$0xff] }
 0x12e   : > { %v904_v27 = vadd.f32 %v903_v50, %v817_v39  ;;  %v5124_v50 = vpop.f32.mrf.mxu2 }
 0x12f   : > { %1728 = vmatpush.xpose.msra.mxu0 %v5914_v35  ;;  %1793 = vmatpush.xpose.msra.mxu1 %v4828_v25  ;;  %v1847_v25 = vld [vmem:[%s5795_s3] sm:$0xff]  ;;  %v957_v1 = vadd.f32 %v956_v12, %v908_v24  ;;  %v915_v26 = vpop.f32.mrf.mxu0  ;;  %v1849_v12 = vld [vmem:[%s5795_s3 + $0x10] sm:$0xff] }
 0x130   : > { %v1877_v14 = vsel %vm1875_vm1, %v1847_v25, 0 }
 0x131   : > { %v5116_v38 = vand.u32 4294901760, %v1877_v14  ;;  %v1838_v63 = vmax.f32 %v957_v1, 0.0 }
 0x132   : > { %1462 = vmatmul.f32.gmra.mxu0 %v4595_v16  ;;  %1571 = vmatmul.f32.gmra.mxu1 %v4501_v60  ;;  %v835_v16 = vadd.f32 %v834_v6, %v778_v58 }
 0x133   : > { %1732 = vmatpush.xpose.msra.mxu0 %v5915_v45  ;;  %1795 = vmatpush.xpose.msra.mxu1 %v4845_v52  ;;  %v960_v52 = vpop.f32.mrf.mxu1  ;;  %v5130_v13 = vsub.f32 %v1877_v14, %v5116_v38  ;;  %v5138_v15 = vand.u32 4294901760, %v1838_v63  ;;  %v1883_v45 = vsel %vm1875_vm1, %v1849_v12, 0 }
 0x134   : > { %1701 = vmatmul.f32.gmra.mxu3 %v5904_v44  ;;  %1644 = vmatmul.f32.gmra.mxu2 %v5903_v20  ;;  %v961_v41 = vadd.f32 %v960_v52, %v912_v32  ;;  %v5917_v44 = vand.u32 4294901760, %v4933_v28  ;;  %v916_v20 = vadd.f32 %v915_v26, %v835_v16 }
 0x135   : > { %v5141_v9 = vand.u32 4294901760, %v5130_v13  ;;  %v5156_v23 = vsub.f32 %v1838_v63, %v5138_v15  ;;  %v5923_v63 = vand.u32 4294901760, %v5029_v59 }
 0x136   : > { %v1841_v42 = vmax.f32 %v961_v41, 0.0  ;;  %v5169_v31 = vpop.f32.mrf.mxu2 }
 0x137   : > { %1736 = vmatpush.xpose.msra.mxu0 %v5916_v54  ;;  %1797 = vmatpush.xpose.msra.mxu1 %v4859_v18  ;;  %v953_v18 = vadd.f32 %v952_v19, %v904_v27  ;;  %v1911_v40 = vsub.f32 %v5130_v13, %v5141_v9  ;;  %v1967_v6 = vand.u32 4294901760, %v5156_v23  ;;  %v5191_v54 = vand.u32 4294901760, %v1883_v45 }
 0x138   : > { %v5132_v28 = vand.u32 4294901760, %v1841_v42 }
 0x139   : > { %v1835_v5 = vmax.f32 %v953_v18, 0.0  ;;  %v1968_v52 = vsub.f32 %v5156_v23, %v1967_v6  ;;  %v5206_v16 = vsub.f32 %v1883_v45, %v5191_v54  ;;  %v1014_v45 = vadd.f32 %v5169_v31, %v5058_v36 }
 0x13a   : > { %1575 = vmatmul.f32.gmra.mxu1 %v4551_v8 }
 0x13b   : > { %1740 = vmatpush.xpose.msra.mxu0 %v5917_v44  ;;  %1799 = vmatpush.xpose.msra.mxu1 %v4872_v61  ;;  %v5918_v61 = vand.u32 4294901760, %v4952_v2  ;;  %v964_v19 = vpop.f32.mrf.mxu1  ;;  %v5147_v2 = vsub.f32 %v1841_v42, %v5132_v28  ;;  %v5151_v51 = vand.u32 4294901760, %v1835_v5  ;;  %v1886_v42 = vsel %vm1875_vm1, %v1850_v0, 0 }
 0x13c   : > { %v965_v47 = vadd.f32 %v964_v19, %v916_v20  ;;  %v1969_v44 = vand.u32 4294901760, %v1968_v52  ;;  %v5219_v53 = vand.u32 4294901760, %v5206_v16 }
 0x13d   : > { %v1961_v49 = vand.u32 4294901760, %v5147_v2  ;;  %v5179_v25 = vsub.f32 %v1835_v5, %v5151_v51  ;;  %v5925_v5 = vand.u32 4294901760, %v5039_v55  ;;  %v5927_v55 = vld [vmem:[#allocation4_spill] sm:$0xff] }
 0x13e   : > { %v1844_v43 = vmax.f32 %v965_v47, 0.0  ;;  %v1927_v59 = vsub.f32 %v5206_v16, %v5219_v53  ;;  %v5926_v47 = vld [vmem:[#allocation3_spill] sm:$0xff] }
 0x13f   : > { %1744 = vmatpush.xpose.msra.mxu0 %v5918_v61  ;;  %1801 = vmatpush.xpose.msra.mxu1 %v4890_v62  ;;  %v5149_v62 = vand.u32 4294901760, %v1880_v17  ;;  %v1962_v32 = vsub.f32 %v5147_v2, %v1961_v49  ;;  %v1973_v27 = vand.u32 4294901760, %v5179_v25  ;;  %v5924_v61 = vld [vmem:[#allocation7_spill] sm:$0xff] }
 0x140   : > { %v5153_v35 = vand.u32 4294901760, %v1844_v43 }
 0x141   : > { %v5173_v10 = vsub.f32 %v1880_v17, %v5149_v62  ;;  %v1963_v1 = vand.u32 4294901760, %v1962_v32  ;;  %v1974_v18 = vsub.f32 %v5179_v25, %v1973_v27 }
 0x142   : > { %v1954_v4 = vsub.f32 %v1844_v43, %v5153_v35  ;;  %1901 = vmatpush.msra.mxu2 %v5153_v35 }
 0x143   : > { %1748 = vmatpush.xpose.msra.mxu0 %v5919_v48  ;;  %1803 = vmatpush.xpose.msra.mxu1 %v4918_v11  ;;  %v5163_v11 = vpop.f32.mrf.mxu3  ;;  %v5189_v58 = vand.u32 4294901760, %v5173_v10  ;;  %v1975_v19 = vand.u32 4294901760, %v1974_v18  ;;  %v5239_v48 = vand.u32 4294901760, %v1927_v59 }
 0x144   : > { %v1955_v39 = vand.u32 4294901760, %v1954_v4  ;;  %1903 = vmatpush.msra.mxu2 %v5132_v28 }
 0x145   : > { %v1919_v41 = vsub.f32 %v5173_v10, %v5189_v58 }
 0x146   : > { %v1956_v24 = vsub.f32 %v1954_v4, %v1955_v39  ;;  %1905 = vmatpush.msra.mxu2 %v5138_v15 }
 0x147   : > { %1752 = vmatpush.xpose.msra.mxu0 %v5920_v22  ;;  %1805 = vmatpush.xpose.msra.mxu1 %v4930_v37  ;;  %v5182_v37 = vand.u32 4294901760, %v1911_v40  ;;  %v5216_v20 = vand.u32 4294901760, %v1919_v41 }
 0x148   : > { %v1957_v14 = vand.u32 4294901760, %v1956_v24  ;;  %1907 = vmatpush.msra.mxu2 %v5151_v51 }
 0x149   : > { %1913 = vmatmul.f32.vlgmr.msra.gmra.mxu2 %v5182_v37 }
 0x14a   : > { %2008 = vmatpush.msrb.mxu2 %v1954_v4  ;;  %1958 = vmatpush.msra.mxu3 %v1957_v14  ;;  %v5928_v4 = vld [vmem:[#allocation5_spill] sm:$0xff] }
 0x14b   : > { %1756 = vmatpush.xpose.msra.mxu0 %v5921_v56  ;;  %1807 = vmatpush.xpose.msra.mxu1 %v4948_v57  ;;  %v5922_v57 = vand.u32 4294901760, %v5016_v34  ;;  %v5209_v26 = vpop.f32.mrf.mxu3  ;;  %v1021_v34 = vpop.f32.mrf.mxu2  ;;  %v1006_v56 = vadd.f32 %v5124_v50, %v5076_v3 }
 0x14c   : > { %2011 = vmatpush.msrb.mxu2 %v5147_v2  ;;  %1964 = vmatpush.msra.mxu3 %v1963_v1 }
 0x14e   : > { %2014 = vmatpush.msrb.mxu2 %v5156_v23  ;;  %1970 = vmatpush.msra.mxu3 %v1969_v44 }
 0x14f   : > { %1760 = vmatpush.xpose.msra.mxu0 %v5922_v57  ;;  %1809 = vmatpush.xpose.msra.mxu1 %v4959_v7  ;;  %v5221_v7 = vand.u32 4294901760, %v1886_v42 }
 0x150   : > { %2017 = vmatpush.msrb.mxu2 %v5179_v25  ;;  %1976 = vmatpush.msra.mxu3 %v1975_v19 }
 0x151   : > { %1921 = vmatmul.f32.gmra.mxu2 %v5216_v20  ;;  %v5230_v17 = vsub.f32 %v1886_v42, %v5221_v7  ;;  %1978 = vmatmul.f32.vlgmr.msra.gmra.mxu3 %v5116_v38 }
 0x152   : > { %2052 = vmatpush.msrb.mxu3 %v5153_v35 }
 0x153   : > { %1764 = vmatpush.xpose.msra.mxu0 %v5923_v63  ;;  %1811 = vmatpush.xpose.msra.mxu1 %v5924_v61  ;;  %v1142_v43 = vpop.f32.mrf.mxu3  ;;  %v1029_v2 = vpop.f32.mrf.mxu2  ;;  %v5242_v23 = vand.u32 4294901760, %v5230_v17 }
 0x154   : > { %2054 = vmatpush.msrb.mxu3 %v5132_v28 }
 0x155   : > { %v1935_v40 = vsub.f32 %v5230_v17, %v5242_v23 }
 0x156   : > { %2056 = vmatpush.msrb.mxu3 %v5138_v15 }
 0x157   : > { %1768 = vmatpush.xpose.msra.mxu0 %v5925_v5  ;;  %1813 = vmatpush.xpose.msra.mxu1 %v5926_v47  ;;  %v1196_v12 = vpop.f32.mrf.mxu0  ;;  %v5254_v22 = vand.u32 4294901760, %v1935_v40 }
 0x158   : > { %2058 = vmatpush.msrb.mxu3 %v5151_v51 }
 0x159   : > { %1929 = vmatmul.f32.gmra.mxu2 %v5239_v48  ;;  %1982 = vmatmul.f32.gmra.mxu3 %v5149_v62 }
 0x15a   : > { %1770 = vmatmul.f32.vlgmr.msra.gmra.mxu0 %v4403_v30 }
 0x15b   : > { %2099 = vmatpush.msrb.mxu0 %v1955_v39  ;;  %1815 = vmatpush.xpose.msra.mxu1 %v5927_v55 }
 0x15d   : > { %2103 = vmatpush.msrb.mxu0 %v1961_v49 }
 0x15f   : > { %2107 = vmatpush.msrb.mxu0 %v1967_v6  ;;  %1817 = vmatpush.xpose.msra.mxu1 %v5928_v4  ;;  %v1250_v39 = vpop.f32.mrf.mxu1  ;;  %v1337_v6 = vpop.f32.mrf.mxu2 }
 0x160   : > { %v1386_v49 = vpop.f32.mrf.mxu3  ;;  %v1201_v25 = vpop.f32.mrf.mxu0 }
 0x161   : > { %2111 = vmatpush.msrb.mxu0 %v1973_v27  ;;  %1937 = vmatmul.f32.gmra.mxu2 %v5254_v22 }
 0x162   : > { %1774 = vmatmul.f32.gmra.mxu0 %v4452_v46  ;;  %1819 = vmatmul.f32.vlgmr.msra.gmra.mxu1 %v4403_v30  ;;  %v1135_v30 = vadd.f32 %v5163_v11, %v1014_v45  ;;  %v1030_v11 = vadd.f32 %v1029_v2, %v5052_v29 }
 0x163   : > { %2142 = vmatpush.msrb.mxu1 %v5153_v35  ;;  %1986 = vmatmul.f32.gmra.mxu3 %v5191_v54  ;;  %v1022_v35 = vadd.f32 %v1021_v34, %v5069_v33 }
 0x164   : > { %v1202_v50 = vadd.f32 %v1201_v25, %v1135_v30  ;;  %v1143_v1 = vadd.f32 %v1142_v43, %v1030_v11 }
 0x165   : > { %2144 = vmatpush.msrb.mxu1 %v5132_v28  ;;  %v1131_v28 = vadd.f32 %v5121_v21, %v1006_v56 }
 0x167   : > { %2146 = vmatpush.msrb.mxu1 %v5138_v15  ;;  %v1256_v24 = vpop.f32.mrf.mxu1  ;;  %v1139_v15 = vadd.f32 %v5209_v26, %v1022_v35  ;;  %v1341_v32 = vpop.f32.mrf.mxu2  ;;  %v1197_v52 = vadd.f32 %v1196_v12, %v1131_v28 }
 0x168   : > { %v1390_v31 = vpop.f32.mrf.mxu3  ;;  %v1206_v14 = vpop.f32.mrf.mxu0 }
 0x169   : > { %2148 = vmatpush.msrb.mxu1 %v5151_v51  ;;  %2020 = vmatmul.f32.vlgmr.msrb.gmra.mxu2 %v5130_v13  ;;  %v1257_v51 = vadd.f32 %v1256_v24, %v1202_v50  ;;  %v1207_v21 = vadd.f32 %v1206_v14, %v1139_v15  ;;  %v1251_v27 = vadd.f32 %v1250_v39, %v1197_v52  ;;  %v1854_v14 = vld [vmem:[%s5796_s4 + $0x18] sm:$0xff] }
 0x16a   : > { %1778 = vmatmul.f32.gmra.mxu0 %v4501_v60  ;;  %1823 = vmatmul.f32.gmra.mxu1 %v4452_v46 }
 0x16b   : > { %1990 = vmatmul.f32.gmra.mxu3 %v5221_v7  ;;  %v1342_v46 = vadd.f32 %v1341_v32, %v1257_v51  ;;  %v1338_v42 = vadd.f32 %v1337_v6, %v1251_v27  ;;  %1872 = vperm.xlu2 %3919, %v1854_v14  }
 0x16d   : > { %v1391_v34 = vadd.f32 %v1390_v31, %v1342_v46  ;;  %v1387_v19 = vadd.f32 %v1386_v49, %v1338_v42  ;;  %v1853_v46 = vld [vmem:[%s5796_s4 + $0x10] sm:$0xff] }
 0x16f   : > { %v1262_v0 = vpop.f32.mrf.mxu1  ;;  %v1345_v26 = vpop.f32.mrf.mxu2  ;;  %v1839_v59 = vmax.f32 %v1391_v34, 0.0  ;;  %v1836_v2 = vmax.f32 %v1387_v19, 0.0 }
 0x170   : > { %v1394_v57 = vpop.f32.mrf.mxu3  ;;  %v1263_v41 = vadd.f32 %v1262_v0, %v1207_v21  ;;  %v1211_v44 = vpop.f32.mrf.mxu0 }
 0x171   : > { %2025 = vmatmul.f32.gmra.mxu2 %v5173_v10  ;;  %v1212_v61 = vadd.f32 %v1211_v44, %v1143_v1  ;;  %v2182_v4 = vand.u32 4294901760, %v1839_v59  ;;  %v2184_v49 = vand.u32 4294901760, %v1836_v2 }
 0x172   : > { %1782 = vmatmul.f32.gmra.mxu0 %v4551_v8  ;;  %1827 = vmatmul.f32.gmra.mxu1 %v4501_v60  ;;  %v1346_v18 = vadd.f32 %v1345_v26, %v1263_v41 }
 0x173   : > { %2062 = vmatmul.f32.vlgmr.msrb.gmra.mxu3 %v5141_v9  ;;  %v2250_v56 = vsub.f32 %v1836_v2, %v2184_v49  ;;  %1867 = vperm.xlu2 %3919, %v1853_v46  }
 0x174   : > { %v1395_v63 = vadd.f32 %v1394_v57, %v1346_v18 }
 0x175   : > { %v2251_v24 = vand.u32 4294901760, %v2250_v56 }
 0x176   : > { %v1842_v60 = vmax.f32 %v1395_v63, 0.0 }
 0x177   : > { %v1268_v5 = vpop.f32.mrf.mxu1  ;;  %v1349_v43 = vpop.f32.mrf.mxu2  ;;  %v2252_v11 = vsub.f32 %v2250_v56, %v2251_v24 }
 0x178   : > { %v1269_v47 = vadd.f32 %v1268_v5, %v1212_v61  ;;  %v2180_v55 = vand.u32 4294901760, %v1842_v60  ;;  %v1398_v12 = vpop.f32.mrf.mxu3 }
 0x179   : > { %2030 = vmatmul.f32.gmra.mxu2 %v5206_v16  ;;  %v2253_v27 = vand.u32 4294901760, %v2252_v11 }
 0x17a   : > { %2113 = vmatmul.f32.vlgmr.msrb.gmra.mxu0 %v5116_v38  ;;  %1831 = vmatmul.f32.gmra.mxu1 %v4551_v8  ;;  %v1350_v40 = vadd.f32 %v1349_v43, %v1269_v47  ;;  %v2238_v39 = vsub.f32 %v1842_v60, %v2180_v55  ;;  %v2244_v8 = vsub.f32 %v1839_v59, %v2182_v4 }
 0x17b   : > { %2068 = vmatmul.f32.gmra.mxu3 %v5189_v58 }
 0x17c   : > { %v1399_v45 = vadd.f32 %v1398_v12, %v1350_v40  ;;  %v2239_v30 = vand.u32 4294901760, %v2238_v39  ;;  %v2245_v28 = vand.u32 4294901760, %v2244_v8 }
 0x17e   : > { %v1845_v6 = vmax.f32 %v1399_v45, 0.0  ;;  %v2240_v50 = vsub.f32 %v2238_v39, %v2239_v30  ;;  %v2246_v32 = vsub.f32 %v2244_v8, %v2245_v28 }
 0x180   : > { %v2178_v25 = vand.u32 4294901760, %v1845_v6  ;;  %v2241_v51 = vand.u32 4294901760, %v2240_v50  ;;  %v2247_v21 = vand.u32 4294901760, %v2246_v32 }
 0x181   : > { %2035 = vmatmul.f32.gmra.mxu2 %v5230_v17 }
 0x182   : > { %2117 = vmatmul.f32.gmra.mxu0 %v5149_v62  ;;  %2150 = vmatmul.f32.vlgmr.msrb.gmra.mxu1 %v5116_v38  ;;  %v2232_v35 = vsub.f32 %v1845_v6, %v2178_v25 }
 0x183   : > { %2074 = vmatmul.f32.gmra.mxu3 %v5219_v53  ;;  %2179 = vmatpush.msra.mxu2 %v2178_v25 }
 0x184   : > { %2330 = vmatpush.msra.mxu1 %v2178_v25  ;;  %v2233_v31 = vand.u32 4294901760, %v2232_v35  ;;  %2286 = vmatpush.msra.mxu0 %v2232_v35 }
 0x185   : > { %2181 = vmatpush.msra.mxu2 %v2180_v55 }
 0x186   : > { %2332 = vmatpush.msra.mxu1 %v2180_v55  ;;  %v2234_v15 = vsub.f32 %v2232_v35, %v2233_v31  ;;  %2289 = vmatpush.msra.mxu0 %v2238_v39 }
 0x187   : > { %2183 = vmatpush.msra.mxu2 %v2182_v4 }
 0x188   : > { %2334 = vmatpush.msra.mxu1 %v2182_v4  ;;  %v2235_v52 = vand.u32 4294901760, %v2234_v15  ;;  %2292 = vmatpush.msra.mxu0 %v2244_v8 }
 0x189   : > { %2185 = vmatpush.msra.mxu2 %v2184_v49 }
 0x18a   : > { %2121 = vmatmul.f32.gmra.mxu0 %v5191_v54  ;;  %2154 = vmatmul.f32.gmra.mxu1 %v5149_v62 }
 0x18b   : > { %2191 = vmatmul.f32.vlgmr.msra.gmra.mxu2 %v5182_v37  ;;  %2080 = vmatmul.f32.gmra.mxu3 %v5242_v23 }
 0x18c   : > { %2377 = vmatpush.msrb.mxu2 %v2233_v31  ;;  %2236 = vmatpush.msra.mxu3 %v2235_v52 }
 0x18d   : > { %2295 = vmatpush.msra.mxu0 %v2250_v56  ;;  %2336 = vmatpush.msra.mxu1 %v2184_v49 }
 0x18e   : > { %2381 = vmatpush.msrb.mxu2 %v2239_v30  ;;  %2242 = vmatpush.msra.mxu3 %v2241_v51 }
 0x190   : > { %2385 = vmatpush.msrb.mxu2 %v2245_v28  ;;  %2248 = vmatpush.msra.mxu3 %v2247_v21 }
 0x192   : > { %2125 = vmatmul.f32.gmra.mxu0 %v5221_v7  ;;  %2158 = vmatmul.f32.gmra.mxu1 %v5191_v54 }
 0x193   : > { %2389 = vmatpush.msrb.mxu2 %v2251_v24  ;;  %2254 = vmatpush.msra.mxu3 %v2253_v27 }
 0x194   : > { %2199 = vmatmul.f32.gmra.mxu2 %v5216_v20  ;;  %2256 = vmatmul.f32.vlgmr.msra.gmra.mxu3 %v5116_v38 }
 0x195   : > { %2420 = vmatpush.msrb.mxu3 %v2178_v25 }
 0x197   : > { %2422 = vmatpush.msrb.mxu3 %v2180_v55  ;;  %v1439_v57 = vpop.f32.mrf.mxu0 }
 0x198   : > { %v1440_v25 = vadd.f32 %v1439_v57, %v5076_v3 }
 0x199   : > { %2424 = vmatpush.msrb.mxu3 %v2182_v4 }
 0x19a   : > { %2298 = vmatmul.f32.vlgmr.msra.gmra.mxu0 %v5130_v13  ;;  %2162 = vmatmul.f32.gmra.mxu1 %v5221_v7 }
 0x19b   : > { %2426 = vmatpush.msrb.mxu3 %v2184_v49 }
 0x19c   : > { %2207 = vmatmul.f32.gmra.mxu2 %v5239_v48  ;;  %2260 = vmatmul.f32.gmra.mxu3 %v5149_v62 }
 0x19f   : > { %v1630_v0 = vpop.f32.mrf.mxu2  ;;  %v1684_v1 = vpop.f32.mrf.mxu3 }
 0x1a0   : > { %v1564_v26 = vpop.f32.mrf.mxu1  ;;  %v1447_v42 = vpop.f32.mrf.mxu0 }
 0x1a1   : > { %v1448_v6 = vadd.f32 %v1447_v42, %v5058_v36  ;;  %v1565_v35 = vadd.f32 %v1564_v26, %v1440_v25 }
 0x1a2   : > { %2303 = vmatmul.f32.gmra.mxu0 %v5173_v10  ;;  %2340 = vmatmul.f32.vlgmr.msra.gmra.mxu1 %v5141_v9 }
 0x1a3   : > { %v1631_v14 = vadd.f32 %v1630_v0, %v1565_v35 }
 0x1a4   : > { %2215 = vmatmul.f32.gmra.mxu2 %v5254_v22  ;;  %2264 = vmatmul.f32.gmra.mxu3 %v5191_v54 }
 0x1a5   : > { %v1685_v21 = vadd.f32 %v1684_v1, %v1631_v14 }
 0x1a7   : > { %v1635_v41 = vpop.f32.mrf.mxu2  ;;  %v1690_v44 = vpop.f32.mrf.mxu3 }
 0x1a8   : > { %v1568_v34 = vpop.f32.mrf.mxu1  ;;  %v1455_v63 = vpop.f32.mrf.mxu0 }
 0x1a9   : > { %v1456_v39 = vadd.f32 %v1455_v63, %v5069_v33  ;;  %v1569_v56 = vadd.f32 %v1568_v34, %v1448_v6 }
 0x1aa   : > { %2308 = vmatmul.f32.gmra.mxu0 %v5206_v16  ;;  %2346 = vmatmul.f32.gmra.mxu1 %v5189_v58 }
 0x1ab   : > { %v1636_v24 = vadd.f32 %v1635_v41, %v1569_v56 }
 0x1ac   : > { %2391 = vmatmul.f32.vlgmr.msrb.gmra.mxu2 %v5116_v38  ;;  %2268 = vmatmul.f32.gmra.mxu3 %v5221_v7 }
 0x1ad   : > { %v1691_v33 = vadd.f32 %v1690_v44, %v1636_v24 }
 0x1af   : > { %v1640_v18 = vpop.f32.mrf.mxu2  ;;  %v1696_v61 = vpop.f32.mrf.mxu3 }
 0x1b0   : > { %v1572_v60 = vpop.f32.mrf.mxu1  ;;  %v1463_v59 = vpop.f32.mrf.mxu0 }
 0x1b1   : > { %v1573_v8 = vadd.f32 %v1572_v60, %v1456_v39  ;;  %v1464_v32 = vadd.f32 %v1463_v59, %v5052_v29 }
 0x1b2   : > { %2313 = vmatmul.f32.gmra.mxu0 %v5230_v17  ;;  %2352 = vmatmul.f32.gmra.mxu1 %v5219_v53 }
 0x1b3   : > { %v1641_v31 = vadd.f32 %v1640_v18, %v1573_v8 }
 0x1b4   : > { %2395 = vmatmul.f32.gmra.mxu2 %v5149_v62  ;;  %2428 = vmatmul.f32.vlgmr.msrb.gmra.mxu3 %v5116_v38 }
 0x1b5   : > { %v1697_v52 = vadd.f32 %v1696_v61, %v1641_v31 }
 0x1b7   : > { %v1645_v19 = vpop.f32.mrf.mxu2  ;;  %v1702_v47 = vpop.f32.mrf.mxu3 }
 0x1b8   : > { %v1576_v2 = vpop.f32.mrf.mxu1 }
 0x1b9   : > { %v1577_v51 = vadd.f32 %v1576_v2, %v1464_v32 }
 0x1ba   : > { %2358 = vmatmul.f32.gmra.mxu1 %v5242_v23 }
 0x1bb   : > { %v1646_v46 = vadd.f32 %v1645_v19, %v1577_v51 }
 0x1bc   : > { %2399 = vmatmul.f32.gmra.mxu2 %v5191_v54  ;;  %2432 = vmatmul.f32.gmra.mxu3 %v5149_v62 }
 0x1bd   : > { %v1703_v63 = vadd.f32 %v1702_v47, %v1646_v46 }
 0x1c4   : > { %2403 = vmatmul.f32.gmra.mxu2 %v5221_v7  ;;  %2436 = vmatmul.f32.gmra.mxu3 %v5191_v54 }
 0x1c5   : > { %v5341_v41 = vpop.permute.xlu2 %1872 }
 0x1cc   : > { %2440 = vmatmul.f32.gmra.mxu3 %v5221_v7  ;;  %v5323_v5 = vpop.f32.mrf.mxu2 }
 0x1cd   : > { %v5354_v47 = vpop.permute.xlu2 %1867 }
 0x1d4   : > { %v5325_v55 = vpop.f32.mrf.mxu2  ;;  %v5327_v12 = vpop.f32.mrf.mxu3 }
 0x1d7   : > { %v1771_v43 = vpop.f32.mrf.mxu0 }
 0x1d8   : > { %v1772_v42 = vadd.f32 %v1771_v43, %v1685_v21 }
 0x1dc   : > { %v1930_v45 = vpop.f32.mrf.mxu2  ;;  %v5329_v49 = vpop.f32.mrf.mxu3 }
 0x1df   : > { %v1775_v40 = vpop.f32.mrf.mxu0  ;;  %v1820_v4 = vpop.f32.mrf.mxu1 }
 0x1e0   : > { %v1776_v27 = vadd.f32 %v1775_v40, %v1691_v33  ;;  %v1821_v29 = vadd.f32 %v1820_v4, %v1772_v42  ;;  %v5379_v42 = vpop.permute.xlu1 %1857 }
 0x1e2   : > { %v1837_v1 = vmax.f32 %v1821_v29, 0.0  ;;  %v1915_v29 = vadd.f32 %v5323_v5, %v5379_v42 }
 0x1e4   : > { %v5334_v50 = vpop.f32.mrf.mxu2  ;;  %v5351_v8 = vand.u32 4294901760, %v1837_v1 }
 0x1e6   : > { %v1987_v15 = vpop.f32.mrf.mxu3  ;;  %v2528_v31 = vsub.f32 %v1837_v1, %v5351_v8  ;;  %v1980_v1 = vadd.f32 %v5327_v12, %v1915_v29 }
 0x1e7   : > { %v1779_v30 = vpop.f32.mrf.mxu0  ;;  %v1824_v28 = vpop.f32.mrf.mxu1 }
 0x1e8   : > { %v1780_v11 = vadd.f32 %v1779_v30, %v1697_v52  ;;  %v1825_v18 = vadd.f32 %v1824_v28, %v1776_v27  ;;  %v1931_v28 = vadd.f32 %v1930_v45, %v5354_v47  ;;  %v2529_v21 = vand.u32 4294901760, %v2528_v31  ;;  %v5372_v27 = vpop.permute.xlu0 %1862 }
 0x1e9   : > { %v1923_v46 = vadd.f32 %v5325_v55, %v5372_v27 }
 0x1ea   : > { %v1840_v61 = vmax.f32 %v1825_v18, 0.0 }
 0x1ec   : > { %v5337_v26 = vpop.f32.mrf.mxu2  ;;  %v5347_v39 = vand.u32 4294901760, %v1840_v61 }
 0x1ee   : > { %v5339_v34 = vpop.f32.mrf.mxu3  ;;  %v2522_v56 = vsub.f32 %v1840_v61, %v5347_v39  ;;  %v2530_v61 = vsub.f32 %v2528_v31, %v2529_v21 }
 0x1ef   : > { %v1783_v36 = vpop.f32.mrf.mxu0  ;;  %v1828_v3 = vpop.f32.mrf.mxu1 }
 0x1f0   : > { %v1829_v57 = vadd.f32 %v1828_v3, %v1780_v11  ;;  %v1784_v44 = vadd.f32 %v1783_v36, %v1703_v63  ;;  %v2523_v33 = vand.u32 4294901760, %v2522_v56  ;;  %v1988_v36 = vadd.f32 %v1987_v15, %v1931_v28 }
 0x1f1   : > { %v1939_v15 = vadd.f32 %v5334_v50, %v5341_v41 }
 0x1f2   : > { %v1843_v0 = vmax.f32 %v1829_v57, 0.0  ;;  %v2524_v57 = vsub.f32 %v2522_v56, %v2523_v33 }
 0x1f3   : > { %v1992_v5 = vadd.f32 %v5339_v34, %v1939_v15  ;;  %v2734_v34 = vld [vmem:[%s5797_s5] sm:$0xf] }
 0x1f4   : > { %v5345_v59 = vand.u32 4294901760, %v1843_v0  ;;  %v2026_v40 = vpop.f32.mrf.mxu2 }
 0x1f6   : > { %v5349_v43 = vpop.f32.mrf.mxu3  ;;  %v2516_v4 = vsub.f32 %v1843_v0, %v5345_v59  ;;  %v1984_v0 = vadd.f32 %v5329_v49, %v1923_v46 }
 0x1f7   : > { %v5343_v60 = vpop.f32.mrf.mxu0  ;;  %v1832_v19 = vpop.f32.mrf.mxu1 }
 0x1f8   : > { %v1833_v2 = vadd.f32 %v1832_v19, %v1784_v44  ;;  %v2517_v32 = vand.u32 4294901760, %v2516_v4  ;;  %v2027_v50 = vadd.f32 %v2026_v40, %v1984_v0 }
 0x1fa   : > { %v1846_v6 = vmax.f32 %v1833_v2, 0.0  ;;  %v2518_v45 = vsub.f32 %v2516_v4, %v2517_v32  ;;  %v2525_v2 = vand.u32 4294901760, %v2524_v57 }
 0x1fc   : > { %v5356_v25 = vand.u32 4294901760, %v1846_v6  ;;  %v2031_v52 = vpop.f32.mrf.mxu2  ;;  %v2519_v63 = vand.u32 4294901760, %v2518_v45 }
 0x1fd   : > { %v2032_v18 = vadd.f32 %v2031_v52, %v1988_v36 }
 0x1fe   : > { %v2510_v30 = vsub.f32 %v1846_v6, %v5356_v25  ;;  %2457 = vmatpush.msrb.mxu0 %v5356_v25  ;;  %2608 = vmatpush.msra.mxu3 %v5356_v25  ;;  %v2069_v51 = vpop.f32.mrf.mxu3  ;;  %v2022_v6 = vadd.f32 %v5337_v26, %v1980_v1 }
 0x1ff   : > { %v5362_v35 = vpop.f32.mrf.mxu0  ;;  %v5366_v24 = vpop.f32.mrf.mxu1 }
 0x200   : > { %v2511_v14 = vand.u32 4294901760, %v2510_v30  ;;  %2459 = vmatpush.msrb.mxu0 %v5345_v59  ;;  %2564 = vmatpush.msra.mxu2 %v2510_v30 }
 0x201   : > { %2610 = vmatpush.msra.mxu3 %v5345_v59 }
 0x202   : > { %v2512_v11 = vsub.f32 %v2510_v30, %v2511_v14  ;;  %2461 = vmatpush.msrb.mxu0 %v5347_v39  ;;  %2567 = vmatpush.msra.mxu2 %v2516_v4  ;;  %v2070_v4 = vadd.f32 %v2069_v51, %v2027_v50 }
 0x203   : > { %2612 = vmatpush.msra.mxu3 %v5347_v39 }
 0x204   : > { %2463 = vmatpush.msrb.mxu0 %v5351_v8  ;;  %2570 = vmatpush.msra.mxu2 %v2522_v56  ;;  %v2513_v3 = vand.u32 4294901760, %v2512_v11  ;;  %v2036_v44 = vpop.f32.mrf.mxu2  ;;  %v2119_v40 = vadd.f32 %v5362_v35, %v2070_v4 }
 0x205   : > { %2614 = vmatpush.msra.mxu3 %v5351_v8  ;;  %2469 = vmatmul.f32.vlgmr.msrb.gmra.mxu0 %v5182_v37  ;;  %v2037_v12 = vadd.f32 %v2036_v44, %v1992_v5 }
 0x206   : > { %2655 = vmatpush.msra.mxu0 %v2511_v14  ;;  %2514 = vmatpush.msrb.mxu1 %v2513_v3  ;;  %v2075_v19 = vpop.f32.mrf.mxu3 }
 0x207   : > { %2573 = vmatpush.msra.mxu2 %v2528_v31  ;;  %v2155_v55 = vpop.f32.mrf.mxu1  ;;  %2618 = vmatmul.f32.vlgmr.msra.gmra.mxu3 %v5141_v9  ;;  %v2122_v37 = vpop.f32.mrf.mxu0  ;;  %v2076_v49 = vadd.f32 %v2075_v19, %v2032_v18  ;;  %v2531_v9 = vand.u32 4294901760, %v2530_v61 }
 0x208   : > { %2576 = vmatmul.f32.vlgmr.msra.gmra.mxu2 %v5130_v13  ;;  %2659 = vmatpush.msra.mxu0 %v2517_v32  ;;  %v2064_v13 = vadd.f32 %v5349_v43, %v2022_v6  ;;  %v2156_v31 = vadd.f32 %v2155_v55, %v2119_v40 }
 0x209   : > { %2520 = vmatpush.msrb.mxu1 %v2519_v63  ;;  %v2123_v56 = vadd.f32 %v2122_v37, %v2076_v49 }
 0x20a   : > { %2663 = vmatpush.msra.mxu0 %v2523_v33  ;;  %v2115_v28 = vadd.f32 %v5343_v60, %v2064_v13  ;;  %v2725_v33 = vmax.f32 %v2156_v31, 0.0 }
 0x20b   : > { %2526 = vmatpush.msrb.mxu1 %v2525_v2 }
 0x20c   : > { %2667 = vmatpush.msra.mxu0 %v2529_v21  ;;  %v5425_v45 = vand.u32 4294901760, %v2725_v33 }
 0x20d   : > { %2532 = vmatpush.msrb.mxu1 %v2531_v9  ;;  %2477 = vmatmul.f32.gmra.mxu0 %v5216_v20  ;;  %v2735_v20 = vld [vmem:[%s5798_s6] sm:$0xf] }
 0x20e   : > { %2534 = vmatmul.f32.vlgmr.msrb.gmra.mxu1 %v5116_v38  ;;  %v5401_v43 = vpop.f32.mrf.mxu2  ;;  %v2081_v35 = vpop.f32.mrf.mxu3  ;;  %2738 = vperm.xlu2 %3919, %v2735_v20  }
 0x20f   : > { %2698 = vmatpush.msra.mxu1 %v5356_v25  ;;  %v2159_v26 = vpop.f32.mrf.mxu1  ;;  %2624 = vmatmul.f32.gmra.mxu3 %v5189_v58  ;;  %v2126_v32 = vpop.f32.mrf.mxu0  ;;  %v2742_v25 = vsel %vm1875_vm1, %v2734_v34, 0  ;;  %v2082_v14 = vadd.f32 %v2081_v35, %v2037_v12 }
 0x210   : > { %v2160_v30 = vadd.f32 %v2159_v26, %v2123_v56  ;;  %2581 = vmatmul.f32.gmra.mxu2 %v5173_v10  ;;  %v2152_v10 = vadd.f32 %v5366_v24, %v2115_v28  ;;  %v5411_v51 = vand.u32 4294901760, %v2742_v25 }
 0x211   : > { %2700 = vmatpush.msra.mxu1 %v5345_v59  ;;  %v2127_v52 = vadd.f32 %v2126_v32, %v2082_v14 }
 0x212   : > { %v2728_v58 = vmax.f32 %v2160_v30, 0.0  ;;  %v2722_v60 = vmax.f32 %v2152_v10, 0.0  ;;  %v5423_v24 = vsub.f32 %v2742_v25, %v5411_v51 }
 0x213   : > { %2702 = vmatpush.msra.mxu1 %v5347_v39 }
 0x214   : > { %v5413_v11 = vand.u32 4294901760, %v2728_v58  ;;  %v5430_v3 = vand.u32 4294901760, %v2722_v60 }
 0x215   : > { %2704 = vmatpush.msra.mxu1 %v5351_v8  ;;  %2485 = vmatmul.f32.gmra.mxu0 %v5239_v48 }
 0x216   : > { %2538 = vmatmul.f32.gmra.mxu1 %v5149_v62  ;;  %v2792_v8 = vsub.f32 %v2728_v58, %v5413_v11  ;;  %v2804_v18 = vsub.f32 %v2722_v60, %v5430_v3 }
 0x217   : > { %v2163_v59 = vpop.f32.mrf.mxu1  ;;  %2630 = vmatmul.f32.gmra.mxu3 %v5219_v53  ;;  %v5420_v39 = vpop.f32.mrf.mxu2  ;;  %v5433_v53 = vand.u32 4294901760, %v5423_v24 }
 0x218   : > { %v2164_v36 = vadd.f32 %v2163_v59, %v2127_v52  ;;  %2586 = vmatmul.f32.gmra.mxu2 %v5206_v16  ;;  %v5428_v21 = vpop.f32.mrf.mxu3  ;;  %v2798_v16 = vsub.f32 %v2725_v33, %v5425_v45  ;;  %v2793_v57 = vand.u32 4294901760, %v2792_v8  ;;  %v2805_v44 = vand.u32 4294901760, %v2804_v18  ;;  %v2299_v19 = vpop.f32.mrf.mxu0 }
 0x219   : > { %v2767_v55 = vsub.f32 %v5423_v24, %v5433_v53  ;;  %v2201_v28 = vadd.f32 %v5420_v39, %v5372_v27 }
 0x21a   : > { %v2731_v48 = vmax.f32 %v2164_v36, 0.0  ;;  %v2799_v37 = vand.u32 4294901760, %v2798_v16  ;;  %v2806_v2 = vsub.f32 %v2804_v18, %v2805_v44 }
 0x21b   : > { %v5445_v50 = vand.u32 4294901760, %v2767_v55 }
 0x21c   : > { %v2756_v46 = vand.u32 4294901760, %v2731_v48  ;;  %v2807_v9 = vand.u32 4294901760, %v2806_v2 }
 0x21d   : > { %2493 = vmatmul.f32.gmra.mxu0 %v5254_v22  ;;  %v2794_v22 = vsub.f32 %v2792_v8, %v2793_v57 }
 0x21e   : > { %v2786_v15 = vsub.f32 %v2731_v48, %v2756_v46  ;;  %2542 = vmatmul.f32.gmra.mxu1 %v5191_v54  ;;  %2757 = vmatpush.msrb.mxu2 %v2756_v46 }
 0x21f   : > { %2636 = vmatmul.f32.gmra.mxu3 %v5242_v23  ;;  %v2208_v0 = vpop.f32.mrf.mxu2  ;;  %v2800_v23 = vsub.f32 %v2798_v16, %v2799_v37  ;;  %v2341_v4 = vpop.f32.mrf.mxu1 }
 0x220   : > { %v2787_v29 = vand.u32 4294901760, %v2786_v15  ;;  %2591 = vmatmul.f32.gmra.mxu2 %v5230_v17  ;;  %v2261_v63 = vpop.f32.mrf.mxu3  ;;  %v2795_v17 = vand.u32 4294901760, %v2794_v22  ;;  %v2304_v56 = vpop.f32.mrf.mxu0  ;;  %v2209_v40 = vadd.f32 %v2208_v0, %v5354_v47 }
 0x221   : > { %2759 = vmatpush.msrb.mxu2 %v5413_v11  ;;  %v2801_v6 = vand.u32 4294901760, %v2800_v23  ;;  %v2262_v35 = vadd.f32 %v2261_v63, %v2201_v28 }
 0x222   : > { %v2788_v61 = vsub.f32 %v2786_v15, %v2787_v29 }
 0x223   : > { %2761 = vmatpush.msrb.mxu2 %v5425_v45  ;;  %v2305_v52 = vadd.f32 %v2304_v56, %v2262_v35 }
 0x224   : > { %v2789_v1 = vand.u32 4294901760, %v2788_v61 }
 0x225   : > { %2763 = vmatpush.msrb.mxu2 %v5430_v3  ;;  %2669 = vmatmul.f32.vlgmr.msra.gmra.mxu0 %v5116_v38 }
 0x226   : > { %2546 = vmatmul.f32.gmra.mxu1 %v5221_v7  ;;  %2790 = vmatpush.msrb.mxu3 %v2789_v1 }
 0x227   : > { %2828 = vmatpush.msra.mxu2 %v2786_v15  ;;  %v2216_v5 = vpop.f32.mrf.mxu2  ;;  %v2347_v34 = vpop.f32.mrf.mxu1 }
 0x228   : > { %2769 = vmatmul.f32.vlgmr.msrb.gmra.mxu2 %v5445_v50  ;;  %2796 = vmatpush.msrb.mxu3 %v2795_v17  ;;  %v2265_v49 = vpop.f32.mrf.mxu3  ;;  %v2217_v32 = vadd.f32 %v2216_v5, %v5341_v41 }
 0x229   : > { %2831 = vmatpush.msra.mxu2 %v2792_v8  ;;  %v2266_v20 = vadd.f32 %v2265_v49, %v2209_v40 }
 0x22a   : > { %2802 = vmatpush.msrb.mxu3 %v2801_v6 }
 0x22b   : > { %2834 = vmatpush.msra.mxu2 %v2798_v16 }
 0x22c   : > { %2808 = vmatpush.msrb.mxu3 %v2807_v9 }
 0x22d   : > { %2837 = vmatpush.msra.mxu2 %v2804_v18  ;;  %2673 = vmatmul.f32.gmra.mxu0 %v5149_v62 }
 0x22e   : > { %2706 = vmatmul.f32.vlgmr.msra.gmra.mxu1 %v5116_v38  ;;  %2810 = vmatmul.f32.vlgmr.msrb.gmra.mxu3 %v5411_v51  ;;  %v2309_v38 = vpop.f32.mrf.mxu0 }
 0x22f   : > { %2886 = vmatpush.msrb.mxu2 %v2787_v29  ;;  %2857 = vmatpush.msra.mxu3 %v2756_v46  ;;  %v2392_v13 = vpop.f32.mrf.mxu2  ;;  %v2353_v31 = vpop.f32.mrf.mxu1  ;;  %v2310_v25 = vadd.f32 %v2309_v38, %v2266_v20 }
 0x230   : > { %2840 = vmatmul.f32.vlgmr.msra.gmra.mxu2 %v5423_v24  ;;  %v2269_v12 = vpop.f32.mrf.mxu3 }
 0x231   : > { %2890 = vmatpush.msrb.mxu2 %v2793_v57  ;;  %2859 = vmatpush.msra.mxu3 %v5413_v11  ;;  %v2270_v33 = vadd.f32 %v2269_v12, %v2217_v32 }
 0x233   : > { %2894 = vmatpush.msrb.mxu2 %v2799_v37  ;;  %2861 = vmatpush.msra.mxu3 %v5425_v45 }
 0x235   : > { %2898 = vmatpush.msrb.mxu2 %v2805_v44  ;;  %2863 = vmatpush.msra.mxu3 %v5430_v3 }
 0x236   : > { %2677 = vmatmul.f32.gmra.mxu0 %v5191_v54  ;;  %2710 = vmatmul.f32.gmra.mxu1 %v5149_v62  ;;  %v2193_v62 = vadd.f32 %v5401_v43, %v5379_v42  ;;  %v2314_v60 = vpop.f32.mrf.mxu0  ;;  %v2348_v43 = vadd.f32 %v2347_v34, %v2305_v52 }
 0x237   : > { %2917 = vmatpush.msrb.mxu3 %v2756_v46  ;;  %v2396_v26 = vpop.f32.mrf.mxu2  ;;  %v2315_v39 = vadd.f32 %v2314_v60, %v2270_v33 }
 0x238   : > { %2867 = vmatmul.f32.vlgmr.msra.gmra.mxu3 %v5433_v53  ;;  %2900 = vmatmul.f32.vlgmr.msrb.gmra.mxu2 %v5411_v51  ;;  %v2429_v30 = vpop.f32.mrf.mxu3  ;;  %v2258_v58 = vadd.f32 %v5428_v21, %v2193_v62  ;;  %v2397_v48 = vadd.f32 %v2396_v26, %v2348_v43 }
 0x239   : > { %2919 = vmatpush.msrb.mxu3 %v5413_v11  ;;  %v2354_v11 = vadd.f32 %v2353_v31, %v2310_v25 }
 0x23a   : > { %v2300_v59 = vadd.f32 %v2299_v19, %v2258_v58 }
 0x23b   : > { %2921 = vmatpush.msrb.mxu3 %v5425_v45  ;;  %v2359_v45 = vpop.f32.mrf.mxu1 }
 0x23c   : > { %v2342_v8 = vadd.f32 %v2341_v4, %v2300_v59  ;;  %v2360_v16 = vadd.f32 %v2359_v45, %v2315_v39 }
 0x23d   : > { %2923 = vmatpush.msrb.mxu3 %v5430_v3 }
 0x23e   : > { %2681 = vmatmul.f32.gmra.mxu0 %v5221_v7  ;;  %2714 = vmatmul.f32.gmra.mxu1 %v5191_v54  ;;  %v2393_v3 = vadd.f32 %v2392_v13, %v2342_v8 }
 0x23f   : > { %v2400_v10 = vpop.f32.mrf.mxu2 }
 0x240   : > { %2925 = vmatmul.f32.vlgmr.msrb.gmra.mxu3 %v5411_v51  ;;  %v2433_v14 = vpop.f32.mrf.mxu3  ;;  %v2401_v36 = vadd.f32 %v2400_v10, %v2354_v11  ;;  %v2430_v15 = vadd.f32 %v2429_v30, %v2393_v3 }
 0x241   : > { %v2434_v21 = vadd.f32 %v2433_v14, %v2397_v48 }
 0x242   : > { %v2723_v63 = vmax.f32 %v2430_v15, 0.0 }
 0x243   : > { %v2726_v29 = vmax.f32 %v2434_v21, 0.0 }
 0x245   : > { %v2945_v37 = vand.u32 4294901760, %v2726_v29 }
 0x246   : > { %2718 = vmatmul.f32.gmra.mxu1 %v5221_v7  ;;  %v2947_v7 = vand.u32 4294901760, %v2723_v63 }
 0x247   : > { %v2404_v57 = vpop.f32.mrf.mxu2  ;;  %v2983_v17 = vsub.f32 %v2726_v29, %v2945_v37 }
 0x248   : > { %v2437_v54 = vpop.f32.mrf.mxu3  ;;  %v2405_v55 = vadd.f32 %v2404_v57, %v2360_v16  ;;  %v2989_v2 = vsub.f32 %v2723_v63, %v2947_v7 }
 0x249   : > { %v2438_v46 = vadd.f32 %v2437_v54, %v2401_v36  ;;  %v2984_v4 = vand.u32 4294901760, %v2983_v17 }
 0x24a   : > { %v2990_v56 = vand.u32 4294901760, %v2989_v2 }
 0x24b   : > { %v2729_v18 = vmax.f32 %v2438_v46, 0.0  ;;  %v2985_v34 = vsub.f32 %v2983_v17, %v2984_v4 }
 0x24c   : > { %v2991_v40 = vsub.f32 %v2989_v2, %v2990_v56 }
 0x24d   : > { %v2943_v0 = vand.u32 4294901760, %v2729_v18  ;;  %v2986_v38 = vand.u32 4294901760, %v2985_v34 }
 0x24e   : > { %v2992_v26 = vand.u32 4294901760, %v2991_v40 }
 0x24f   : > { %v2977_v61 = vsub.f32 %v2729_v18, %v2943_v0 }
 0x250   : > { %v2441_v22 = vpop.f32.mrf.mxu3 }
 0x251   : > { %v2442_v44 = vadd.f32 %v2441_v22, %v2405_v55  ;;  %v2978_v19 = vand.u32 4294901760, %v2977_v61 }
 0x253   : > { %v2732_v1 = vmax.f32 %v2442_v44, 0.0  ;;  %v2979_v6 = vsub.f32 %v2977_v61, %v2978_v19 }
 0x255   : > { %v2941_v23 = vand.u32 4294901760, %v2732_v1  ;;  %v2980_v12 = vand.u32 4294901760, %v2979_v6 }
 0x257   : > { %v2971_v5 = vsub.f32 %v2732_v1, %v2941_v23  ;;  %2942 = vmatpush.msra.mxu2 %v2941_v23  ;;  %3042 = vmatpush.msrb.mxu1 %v2941_v23 }
 0x259   : > { %v2972_v49 = vand.u32 4294901760, %v2971_v5  ;;  %2944 = vmatpush.msra.mxu2 %v2943_v0  ;;  %3013 = vmatpush.msrb.mxu0 %v2971_v5 }
 0x25a   : > { %3044 = vmatpush.msrb.mxu1 %v2943_v0 }
 0x25b   : > { %v2973_v9 = vsub.f32 %v2971_v5, %v2972_v49  ;;  %2946 = vmatpush.msra.mxu2 %v2945_v37  ;;  %3016 = vmatpush.msrb.mxu0 %v2977_v61 }
 0x25c   : > { %3046 = vmatpush.msrb.mxu1 %v2945_v37 }
 0x25d   : > { %2948 = vmatpush.msra.mxu2 %v2947_v7  ;;  %3019 = vmatpush.msrb.mxu0 %v2983_v17  ;;  %v2974_v13 = vand.u32 4294901760, %v2973_v9 }
 0x25e   : > { %3048 = vmatpush.msrb.mxu1 %v2947_v7  ;;  %2954 = vmatmul.f32.vlgmr.msra.gmra.mxu2 %v5445_v50 }
 0x25f   : > { %3071 = vmatpush.msrb.mxu2 %v2972_v49  ;;  %2975 = vmatpush.msra.mxu3 %v2974_v13 }
 0x260   : > { %3022 = vmatpush.msrb.mxu0 %v2989_v2  ;;  %3052 = vmatmul.f32.vlgmr.msrb.gmra.mxu1 %v5433_v53 }
 0x261   : > { %3075 = vmatpush.msrb.mxu2 %v2978_v19  ;;  %2981 = vmatpush.msra.mxu3 %v2980_v12 }
 0x262   : > { %3025 = vmatmul.f32.vlgmr.msrb.gmra.mxu0 %v5423_v24 }
 0x263   : > { %3079 = vmatpush.msrb.mxu2 %v2984_v4  ;;  %2987 = vmatpush.msra.mxu3 %v2986_v38 }
 0x265   : > { %3083 = vmatpush.msrb.mxu2 %v2990_v56  ;;  %2993 = vmatpush.msra.mxu3 %v2992_v26 }
 0x266   : > { %2995 = vmatmul.f32.vlgmr.msra.gmra.mxu3 %v5411_v51  ;;  %3085 = vmatmul.f32.vlgmr.msrb.gmra.mxu2 %v5411_v51 }
 0x267   : > { %3102 = vmatpush.msrb.mxu3 %v2941_v23 }
 0x269   : > { %3104 = vmatpush.msrb.mxu3 %v2943_v0 }
 0x26b   : > { %3106 = vmatpush.msrb.mxu3 %v2945_v37 }
 0x26d   : > { %3108 = vmatpush.msrb.mxu3 %v2947_v7 }
 0x26e   : > { %3110 = vmatmul.f32.vlgmr.msrb.gmra.mxu3 %v5411_v51 }
 0x282   : > { %v2470_v30 = vpop.f32.mrf.mxu0 }
 0x283   : > { %v2471_v36 = vadd.f32 %v2470_v30, %v5379_v42 }
 0x28a   : > { %v2478_v20 = vpop.f32.mrf.mxu0  ;;  %v2619_v58 = vpop.f32.mrf.mxu3 }
 0x28b   : > { %v2535_v28 = vpop.f32.mrf.mxu1  ;;  %v2577_v25 = vpop.f32.mrf.mxu2  ;;  %v2479_v59 = vadd.f32 %v2478_v20, %v5372_v27 }
 0x28c   : > { %v2536_v48 = vadd.f32 %v2535_v28, %v2471_v36 }
 0x28e   : > { %v2578_v57 = vadd.f32 %v2577_v25, %v2536_v48 }
 0x290   : > { %v2620_v27 = vadd.f32 %v2619_v58, %v2578_v57 }
 0x292   : > { %v2486_v31 = vpop.f32.mrf.mxu0  ;;  %v2625_v33 = vpop.f32.mrf.mxu3 }
 0x293   : > { %v2539_v62 = vpop.f32.mrf.mxu1  ;;  %v2582_v52 = vpop.f32.mrf.mxu2  ;;  %v2487_v43 = vadd.f32 %v2486_v31, %v5354_v47 }
 0x294   : > { %v2540_v39 = vadd.f32 %v2539_v62, %v2479_v59 }
 0x296   : > { %v2583_v21 = vadd.f32 %v2582_v52, %v2540_v39 }
 0x298   : > { %v2626_v18 = vadd.f32 %v2625_v33, %v2583_v21 }
 0x29a   : > { %v2494_v35 = vpop.f32.mrf.mxu0  ;;  %v2631_v54 = vpop.f32.mrf.mxu3 }
 0x29b   : > { %v2543_v32 = vpop.f32.mrf.mxu1  ;;  %v2587_v8 = vpop.f32.mrf.mxu2  ;;  %v2495_v15 = vadd.f32 %v2494_v35, %v5341_v41 }
 0x29c   : > { %v2544_v45 = vadd.f32 %v2543_v32, %v2487_v43 }
 0x29e   : > { %v2588_v46 = vadd.f32 %v2587_v8, %v2544_v45 }
 0x2a0   : > { %v2632_v29 = vadd.f32 %v2631_v54, %v2588_v46 }
 0x2a2   : > { %v2670_v14 = vpop.f32.mrf.mxu0  ;;  %v2637_v7 = vpop.f32.mrf.mxu3 }
 0x2a3   : > { %v2547_v10 = vpop.f32.mrf.mxu1  ;;  %v2592_v63 = vpop.f32.mrf.mxu2  ;;  %v2671_v37 = vadd.f32 %v2670_v14, %v2620_v27 }
 0x2a4   : > { %v2548_v0 = vadd.f32 %v2547_v10, %v2495_v15 }
 0x2a6   : > { %v2593_v22 = vadd.f32 %v2592_v63, %v2548_v0 }
 0x2a8   : > { %v2638_v19 = vadd.f32 %v2637_v7, %v2593_v22 }
 0x2aa   : > { %v2674_v11 = vpop.f32.mrf.mxu0 }
 0x2ab   : > { %v2707_v60 = vpop.f32.mrf.mxu1  ;;  %v2675_v55 = vadd.f32 %v2674_v11, %v2626_v18  ;;  %v2770_v38 = vpop.f32.mrf.mxu2 }
 0x2ac   : > { %v2708_v1 = vadd.f32 %v2707_v60, %v2671_v37 }
 0x2ae   : > { %v2724_v5 = vmax.f32 %v2708_v1, 0.0 }
 0x2b0   : > { %v3132_v56 = vand.u32 4294901760, %v2724_v5 }
 0x2b1   : > { %v2811_v62 = vpop.f32.mrf.mxu3 }
 0x2b2   : > { %v3174_v26 = vsub.f32 %v2724_v5, %v3132_v56 }
 0x2b3   : > { %v2711_v3 = vpop.f32.mrf.mxu1  ;;  %v2678_v16 = vpop.f32.mrf.mxu0 }
 0x2b4   : > { %v2679_v47 = vadd.f32 %v2678_v16, %v2632_v29  ;;  %v2712_v61 = vadd.f32 %v2711_v3, %v2675_v55  ;;  %v3175_v25 = vand.u32 4294901760, %v3174_v26  ;;  %v2841_v33 = vpop.f32.mrf.mxu2 }
 0x2b6   : > { %v2727_v2 = vmax.f32 %v2712_v61, 0.0  ;;  %v3176_v52 = vsub.f32 %v3174_v26, %v3175_v25 }
 0x2b8   : > { %v3130_v4 = vand.u32 4294901760, %v2727_v2  ;;  %v3177_v60 = vand.u32 4294901760, %v3176_v52 }
 0x2ba   : > { %v3168_v34 = vsub.f32 %v2727_v2, %v3130_v4 }
 0x2bb   : > { %v2715_v42 = vpop.f32.mrf.mxu1  ;;  %v2682_v23 = vpop.f32.mrf.mxu0 }
 0x2bc   : > { %v2716_v44 = vadd.f32 %v2715_v42, %v2679_v47  ;;  %v2683_v41 = vadd.f32 %v2682_v23, %v2638_v19  ;;  %v3169_v31 = vand.u32 4294901760, %v3168_v34  ;;  %v2868_v59 = vpop.f32.mrf.mxu3 }
 0x2be   : > { %v2730_v17 = vmax.f32 %v2716_v44, 0.0  ;;  %v3170_v14 = vsub.f32 %v3168_v34, %v3169_v31 }
 0x2c0   : > { %v3128_v49 = vand.u32 4294901760, %v2730_v17  ;;  %v3171_v11 = vand.u32 4294901760, %v3170_v14 }
 0x2c2   : > { %v3162_v13 = vsub.f32 %v2730_v17, %v3128_v49 }
 0x2c3   : > { %v2719_v6 = vpop.f32.mrf.mxu1 }
 0x2c4   : > { %v2720_v9 = vadd.f32 %v2719_v6, %v2683_v41  ;;  %v3163_v20 = vand.u32 4294901760, %v3162_v13 }
 0x2c6   : > { %v2733_v12 = vmax.f32 %v2720_v9, 0.0  ;;  %v3164_v32 = vsub.f32 %v3162_v13, %v3163_v20 }
 0x2c8   : > { %v3126_v40 = vand.u32 4294901760, %v2733_v12  ;;  %v3165_v10 = vand.u32 4294901760, %v3164_v32 }
 0x2ca   : > { %v3156_v30 = vsub.f32 %v2733_v12, %v3126_v40  ;;  %3127 = vmatpush.msra.mxu0 %v3126_v40  ;;  %3227 = vmatpush.msra.mxu3 %v3126_v40 }
 0x2cc   : > { %v3157_v28 = vand.u32 4294901760, %v3156_v30  ;;  %3129 = vmatpush.msra.mxu0 %v3128_v49  ;;  %3198 = vmatpush.msra.mxu2 %v3156_v30 }
 0x2cd   : > { %3229 = vmatpush.msra.mxu3 %v3128_v49 }
 0x2ce   : > { %v3158_v35 = vsub.f32 %v3156_v30, %v3157_v28  ;;  %3131 = vmatpush.msra.mxu0 %v3130_v4  ;;  %3201 = vmatpush.msra.mxu2 %v3162_v13 }
 0x2cf   : > { %3231 = vmatpush.msra.mxu3 %v3130_v4 }
 0x2d0   : > { %3133 = vmatpush.msra.mxu0 %v3132_v56  ;;  %3204 = vmatpush.msra.mxu2 %v3168_v34  ;;  %v3159_v58 = vand.u32 4294901760, %v3158_v35 }
 0x2d1   : > { %3233 = vmatpush.msra.mxu3 %v3132_v56  ;;  %3139 = vmatmul.f32.vlgmr.msra.gmra.mxu0 %v5445_v50  ;;  %v2901_v50 = vpop.f32.mrf.mxu2 }
 0x2d2   : > { %3256 = vmatpush.msrb.mxu0 %v3157_v28  ;;  %3160 = vmatpush.msra.mxu1 %v3159_v58 }
 0x2d3   : > { %3207 = vmatpush.msra.mxu2 %v3174_v26  ;;  %3237 = vmatmul.f32.vlgmr.msra.gmra.mxu3 %v5433_v53  ;;  %v2926_v53 = vpop.f32.mrf.mxu3 }
 0x2d4   : > { %3260 = vmatpush.msrb.mxu0 %v3163_v20  ;;  %3166 = vmatpush.msra.mxu1 %v3165_v10 }
 0x2d5   : > { %3210 = vmatmul.f32.vlgmr.msra.gmra.mxu2 %v5423_v24  ;;  %v2739_v24 = vpop.permute.xlu2 %2738 }
 0x2d6   : > { %3264 = vmatpush.msrb.mxu0 %v3169_v31  ;;  %3172 = vmatpush.msra.mxu1 %v3171_v11  ;;  %v2771_v36 = vadd.f32 %v2770_v38, %v2739_v24 }
 0x2d8   : > { %3268 = vmatpush.msrb.mxu0 %v3175_v25  ;;  %3178 = vmatpush.msra.mxu1 %v3177_v60  ;;  %v2812_v39 = vadd.f32 %v2811_v62, %v2771_v36 }
 0x2d9   : > { %3180 = vmatmul.f32.vlgmr.msra.gmra.mxu1 %v5411_v51  ;;  %3270 = vmatmul.f32.vlgmr.msrb.gmra.mxu0 %v5411_v51 }
 0x2da   : > { %3287 = vmatpush.msrb.mxu1 %v3126_v40  ;;  %v2842_v21 = vadd.f32 %v2841_v33, %v2812_v39 }
 0x2dc   : > { %3289 = vmatpush.msrb.mxu1 %v3128_v49  ;;  %v2869_v57 = vadd.f32 %v2868_v59, %v2842_v21 }
 0x2dd   : > { %v3053_v3 = vpop.f32.mrf.mxu1 }
 0x2de   : > { %3291 = vmatpush.msrb.mxu1 %v3130_v4  ;;  %v2902_v0 = vadd.f32 %v2901_v50, %v2869_v57 }
 0x2df   : > { %v3026_v48 = vpop.f32.mrf.mxu0 }
 0x2e0   : > { %3293 = vmatpush.msrb.mxu1 %v3132_v56  ;;  %v2927_v27 = vadd.f32 %v2926_v53, %v2902_v0 }
 0x2e1   : > { %3295 = vmatmul.f32.vlgmr.msrb.gmra.mxu1 %v5411_v51  ;;  %v2955_v43 = vpop.f32.mrf.mxu2 }
 0x2e2   : > { %v2956_v45 = vadd.f32 %v2955_v43, %v2739_v24 }
 0x2e9   : > { %v2996_v8 = vpop.f32.mrf.mxu3  ;;  %v3086_v16 = vpop.f32.mrf.mxu2 }
 0x2ea   : > { %v2997_v54 = vadd.f32 %v2996_v8, %v2956_v45 }
 0x2ec   : > { %v3027_v46 = vadd.f32 %v3026_v48, %v2997_v54 }
 0x2ee   : > { %v3054_v15 = vadd.f32 %v3053_v3, %v3027_v46 }
 0x2f0   : > { %v3087_v18 = vadd.f32 %v3086_v16, %v3054_v15 }
 0x2f1   : > { %v3111_v29 = vpop.f32.mrf.mxu3 }
 0x2f2   : > { %v3112_v51 = vadd.f32 %v3111_v29, %v3087_v18 }
 0x2f4   : > { %v3301_v55 = vrot.slane %v3112_v51, 4 }
 0x2f6   : > { %v3303_v47 = vsel %vm3302_vm2, %v2927_v27, %v3301_v55 }
 0x2f7   : > { %3305 = vst [vmem:[%s5493_s19] sm:$0xff] %v3303_v47 }
 0x34e   : > { %v3140_v63 = vpop.f32.mrf.mxu0 }
 0x34f   : > { %v3141_v42 = vadd.f32 %v3140_v63, %v2739_v24 }
 0x356   : > { %v3181_v22 = vpop.f32.mrf.mxu1  ;;  %v3238_v44 = vpop.f32.mrf.mxu3 }
 0x357   : > { %v3182_v37 = vadd.f32 %v3181_v22, %v3141_v42  ;;  %v3271_v1 = vpop.f32.mrf.mxu0 }
 0x358   : > { %v3211_v61 = vpop.f32.mrf.mxu2 }
 0x359   : > { %v3212_v7 = vadd.f32 %v3211_v61, %v3182_v37 }
 0x35b   : > { %v3239_v17 = vadd.f32 %v3238_v44, %v3212_v7 }
 0x35d   : > { %v3272_v23 = vadd.f32 %v3271_v1, %v3239_v17  ;;  %3313 = sbr.rel (!%p4140_p4) target bundleno = 1014 (0x3f6), region = 52 }
 0x35e   : > { %v3296_v19 = vpop.f32.mrf.mxu1 }
 0x35f   : > { %v3297_v2 = vadd.f32 %v3296_v19, %v3272_v23 }
 0x361   : > { %3306 = vst [vmem:[%s5493_s19 + $0x8] sm:$0xf] %v3297_v2 }
 0x362   : > { %s5946_s21 = smov (!%p3316_p8, %s3315_s21), 3 }
 0x363   : > { %s5506_s29 = sshll.u32 %s5946_s21, 2 }
 0x364   : > { %p3731_p9 = scmp.eq.s32.totalorder %s5506_s29, 0 }
 0x365   : > { %p3326_p10 = scmp.lt.u32.totalorder (!%p3731_p9), %s5506_s29, 8 }
 0x366   : > { %3325 = sbr.rel (%p3731_p9) target bundleno = 1014 (0x3f6), region = 56 }
 0x36b   : > { %3329 = sbr.rel (%p3326_p10) target bundleno = 1005 (0x3ed), region = 60  ;;  %s5511_s9 = sand.u32 (!%p3326_p10), 7, %s5506_s29  }
 0x36c   : > { %p3346_p11 = scmp.eq.s32.totalorder (!%p3326_p10), %s5511_s9, 0  ;;  %p3732_p12 = scmp.ne.s32.totalorder (!%p3326_p10), %s5511_s9, 0 }
 0x370   : > { %3349 = sbr.rel (%p3732_p12) target bundleno = 940 (0x3ac), region = 75  ;;  %s3350_s27 = sshrl.u32 (!%p3732_p12), %s5506_s29, 3 }
 0x371   : > { %s5518_s30 = sshrl.u32 (!%p3732_p12), %s3350_s27, 5 }
 0x372   : > { %p3733_p13 = scmp.le.s32.totalorder (!%p3732_p12), %s5518_s30, 0 }
 0x375   : > { %3650 = sbr.rel (%p3733_p13) target bundleno = 923 (0x39b), region = 156  ;;  %s5929_s10 = smov (!%p3733_p13), %s5504_s26 }
 0x376   : > { %s5930_s11 = smov (!%p3733_p13), %s5493_s19  ;;  %s5527_s12 = smov (!%p3733_p13), 0  }
 0x377   : > { %s5529_s13 = smov (!%p3733_p13), 0  }
 0x37a LB: >> { %v3361_v5 = vld [vmem:[%s4014_s11] sm:$0xff]  ;;  %v3363_v41 = vld [vmem:[%s4014_s11 + $0x8] sm:$0xff]  ;;  %v3365_v49 = vld [vmem:[%s4014_s11 + $0x10] sm:$0xff]  ;;  %s3425_s15 = sadd.s32 1, %s4018_s12  ;;  %s3355_s13 = sadd.s32 1, %s4022_s13   ;;  %s4022_s13 = sphi %s5529_s13, %s3355_s13   ;;  %s4018_s12 = sphi %s5527_s12, %s5933_s12   ;;  %s4014_s11 = sphi %s5930_s11, %s5932_s11   ;;  %s4010_s10 = sphi %s5929_s10, %s5931_s10  }
 0x37b   : >> { %3362 = vst [vmem:[%s4010_s10] sm:$0xff] %v3361_v5  ;;  %v3367_v6 = vld [vmem:[%s4014_s11 + $0x18] sm:$0xff]  ;;  %p3426_p0 = scmp.ge.s32.totalorder %s3425_s15, %s5518_s30  ;;  %v3369_v4 = vld [vmem:[%s4014_s11 + $0x20] sm:$0xff]  ;;  %v3371_v9 = vld [vmem:[%s4014_s11 + $0x28] sm:$0xff]  ;;  %p3354_p1 = scmp.ge.s32.totalorder %s3355_s13, %s5518_s30 }
 0x37c   : >> { %3364 = vst [vmem:[%s4010_s10 + $0x8] sm:$0xff] %v3363_v41  ;;  %v3373_v56 = vld [vmem:[%s4014_s11 + $0x30] sm:$0xff]  ;;  %v3375_v13 = vld [vmem:[%s4014_s11 + $0x38] sm:$0xff]  ;;  %v3377_v12 = vld [vmem:[%s4014_s11 + $0x40] sm:$0xff] }
 0x37d   : >> { %3366 = vst [vmem:[%s4010_s10 + $0x10] sm:$0xff] %v3365_v49  ;;  %s5948_s15 = smov (%p3426_p0, %s3425_s15), 0  ;;  %v3379_v34 = vld [vmem:[%s4014_s11 + $0x48] sm:$0xff]  ;;  %v3381_v40 = vld [vmem:[%s4014_s11 + $0x50] sm:$0xff]  ;;  %v3383_v38 = vld [vmem:[%s4014_s11 + $0x58] sm:$0xff] }
 0x37e   : >> { %3368 = vst [vmem:[%s4010_s10 + $0x18] sm:$0xff] %v3367_v6  ;;  %s3734_s16 = sshll.u32 %s5948_s15, 8  ;;  %v3385_v26 = vld [vmem:[%s4014_s11 + $0x60] sm:$0xff]  ;;  %v3387_v30 = vld [vmem:[%s4014_s11 + $0x68] sm:$0xff]  ;;  %v3389_v20 = vld [vmem:[%s4014_s11 + $0x70] sm:$0xff]  ;;  %s5933_s12 = smov %s5948_s15 }
 0x37f   : >> { %3370 = vst [vmem:[%s4010_s10 + $0x20] sm:$0xff] %v3369_v4  ;;  %s5561_s17 = scalar_lea.vmem %s5493_s19, %s3734_s16 [#allocation2]   ;;  %s5564_s18 = scalar_lea.vmem %s5504_s26, %s3734_s16   ;;  %v3391_v28 = vld [vmem:[%s4014_s11 + $0x78] sm:$0xff]  ;;  %v3393_v31 = vld [vmem:[%s4014_s11 + $0x80] sm:$0xff]  ;;  %v3395_v62 = vld [vmem:[%s4014_s11 + $0x88] sm:$0xff] }
 0x380   : >> { %3372 = vst [vmem:[%s4010_s10 + $0x28] sm:$0xff] %v3371_v9  ;;  %v3397_v35 = vld [vmem:[%s4014_s11 + $0x90] sm:$0xff]  ;;  %v3399_v32 = vld [vmem:[%s4014_s11 + $0x98] sm:$0xff]  ;;  %v3401_v25 = vld [vmem:[%s4014_s11 + $0xa0] sm:$0xff] }
 0x381   : >> { %3374 = vst [vmem:[%s4010_s10 + $0x30] sm:$0xff] %v3373_v56  ;;  %v3403_v58 = vld [vmem:[%s4014_s11 + $0xa8] sm:$0xff]  ;;  %v3405_v14 = vld [vmem:[%s4014_s11 + $0xb0] sm:$0xff]  ;;  %v3407_v10 = vld [vmem:[%s4014_s11 + $0xb8] sm:$0xff] }
 0x382   : >> { %3376 = vst [vmem:[%s4010_s10 + $0x38] sm:$0xff] %v3375_v13  ;;  %v3409_v52 = vld [vmem:[%s4014_s11 + $0xc0] sm:$0xff]  ;;  %v3411_v33 = vld [vmem:[%s4014_s11 + $0xc8] sm:$0xff]  ;;  %v3413_v11 = vld [vmem:[%s4014_s11 + $0xd0] sm:$0xff] }
 0x383   : >> { %3378 = vst [vmem:[%s4010_s10 + $0x40] sm:$0xff] %v3377_v12  ;;  %v3415_v60 = vld [vmem:[%s4014_s11 + $0xd8] sm:$0xff]  ;;  %v3417_v59 = vld [vmem:[%s4014_s11 + $0xe0] sm:$0xff]  ;;  %v3419_v50 = vld [vmem:[%s4014_s11 + $0xe8] sm:$0xff] }
 0x384   : >> { %3380 = vst [vmem:[%s4010_s10 + $0x48] sm:$0xff] %v3379_v34  ;;  %v3421_v53 = vld [vmem:[%s4014_s11 + $0xf0] sm:$0xff]  ;;  %v3423_v24 = vld [vmem:[%s4014_s11 + $0xf8] sm:$0xff]  ;;  %s5932_s11 = smov %s5561_s17 }
 0x385   : >> { %3382 = vst [vmem:[%s4010_s10 + $0x50] sm:$0xff] %v3381_v40 }
 0x386   : >> { %3384 = vst [vmem:[%s4010_s10 + $0x58] sm:$0xff] %v3383_v38 }
 0x387   : >> { %3386 = vst [vmem:[%s4010_s10 + $0x60] sm:$0xff] %v3385_v26 }
 0x388   : >> { %3388 = vst [vmem:[%s4010_s10 + $0x68] sm:$0xff] %v3387_v30 }
 0x389   : >> { %3390 = vst [vmem:[%s4010_s10 + $0x70] sm:$0xff] %v3389_v20 }
 0x38a   : >> { %3392 = vst [vmem:[%s4010_s10 + $0x78] sm:$0xff] %v3391_v28 }
 0x38b   : >> { %3394 = vst [vmem:[%s4010_s10 + $0x80] sm:$0xff] %v3393_v31 }
 0x38c   : >> { %3396 = vst [vmem:[%s4010_s10 + $0x88] sm:$0xff] %v3395_v62 }
 0x38d   : >> { %3398 = vst [vmem:[%s4010_s10 + $0x90] sm:$0xff] %v3397_v35 }
 0x38e   : >> { %3400 = vst [vmem:[%s4010_s10 + $0x98] sm:$0xff] %v3399_v32 }
 0x38f   : >> { %3402 = vst [vmem:[%s4010_s10 + $0xa0] sm:$0xff] %v3401_v25 }
 0x390   : >> { %3404 = vst [vmem:[%s4010_s10 + $0xa8] sm:$0xff] %v3403_v58 }
 0x391   : >> { %3406 = vst [vmem:[%s4010_s10 + $0xb0] sm:$0xff] %v3405_v14 }
 0x392   : >> { %3408 = vst [vmem:[%s4010_s10 + $0xb8] sm:$0xff] %v3407_v10 }
 0x393   : >> { %3410 = vst [vmem:[%s4010_s10 + $0xc0] sm:$0xff] %v3409_v52 }
 0x394   : >> { %3412 = vst [vmem:[%s4010_s10 + $0xc8] sm:$0xff] %v3411_v33 }
 0x395   : >> { %3414 = vst [vmem:[%s4010_s10 + $0xd0] sm:$0xff] %v3413_v11 }
 0x396   : >> { %3416 = vst [vmem:[%s4010_s10 + $0xd8] sm:$0xff] %v3415_v60  ;;  %3357 = sbr.rel (!%p3354_p1) target bundleno = 890 (0x37a), region = 162 }
 0x397   : >> { %3418 = vst [vmem:[%s4010_s10 + $0xe0] sm:$0xff] %v3417_v59 }
 0x398   : >> { %3420 = vst [vmem:[%s4010_s10 + $0xe8] sm:$0xff] %v3419_v50 }
 0x399   : >> { %3422 = vst [vmem:[%s4010_s10 + $0xf0] sm:$0xff] %v3421_v53 }
 0x39a   : >> { %3424 = vst [vmem:[%s4010_s10 + $0xf8] sm:$0xff] %v3423_v24  ;;  %s5931_s10 = smov %s5564_s18 }
 0x39b PF: > { %s5630_s14 = sand.u32 31, %s3350_s27   ;;  %s3757_s24 = sshll.u32 %s5518_s30, 8 }
 0x39c   : > { %s3436_s20 = scalar_lea.vmem %s5493_s19, %s3757_s24 [#allocation2]   ;;  %s3438_s21 = scalar_lea.vmem %s5504_s26, %s3757_s24  }
 0x39d   : > { %p3739_p2 = scmp.le.s32.totalorder %s5630_s14, 0 }
 0x39e   : > { %s4024_s22 = smov (!%p3739_p2), %s3438_s21   ;;  %s4028_s23 = smov (!%p3739_p2), %s3436_s20  }
 0x39f   : > { %3664 = sbr.rel (%p3739_p2) target bundleno = 940 (0x3ac), region = 167  ;;  %s4032_s15 = smov (!%p3739_p2), 0  }
 0x3a0   : > { %s4036_s16 = smov (!%p3739_p2), 0  }
 0x3a4 LB: >> { %v3448_v43 = vld [vmem:[%s4030_s23] sm:$0xff]  ;;  %s3450_s27 = sadd.s32 1, %s4034_s15  ;;  %s3442_s16 = sadd.s32 1, %s4038_s16   ;;  %s4038_s16 = sphi %s4036_s16, %s3442_s16   ;;  %s4034_s15 = sphi %s4032_s15, %s4033_s15   ;;  %s4030_s23 = sphi %s4028_s23, %s3455_s23   ;;  %s4026_s22 = sphi %s4024_s22, %s3456_s22  }
 0x3a5   : >> { %3449 = vst [vmem:[%s4026_s22] sm:$0xff] %v3448_v43  ;;  %p3451_p3 = scmp.ge.s32.totalorder %s3450_s27, %s5630_s14  ;;  %p3441_p4 = scmp.ge.s32.totalorder %s3442_s16, %s5630_s14 }
 0x3a7   : >> { %s5950_s27 = smov (%p3451_p3, %s3450_s27), 0  ;;  %3444 = sbr.rel (!%p3441_p4) target bundleno = 932 (0x3a4), region = 173 }
 0x3a8   : >> { %s3740_s30 = sshll.u32 %s5950_s27, 3  ;;  %s4033_s15 = smov %s5950_s27  }
 0x3a9   : >> { %s3455_s23 = scalar_lea.vmem %s3436_s20, %s3740_s30 [#allocation2]   ;;  %s3456_s22 = scalar_lea.vmem %s3438_s21, %s3740_s30  }
 0x3ac PF: > { %3459 = sbr.rel (%p3346_p11) target bundleno = 1005 (0x3ed), region = 93  ;;  %s5642_s10 = ssub.s32 (!%p3346_p11), %s5506_s29, %s5511_s9 }
 0x3ad   : > { %s3465_s11 = sshrl.u32 (!%p3346_p11), %s5506_s29, 3  ;;  %s3462_s12 = scalar_lea.vmem (!%p3346_p11), %s5493_s19, %s5642_s10 [#allocation2] }
 0x3ae   : > { %s5651_s17 = sshrl.u32 (!%p3346_p11), %s3465_s11, 5 }
 0x3af   : > { %p3742_p5 = scmp.le.s32.totalorder (!%p3346_p11), %s5651_s17, 0 }
 0x3b1   : > { %3678 = sbr.rel (%p3742_p5) target bundleno = 983 (0x3d7), region = 178  ;;  %s5934_s18 = smov (!%p3742_p5), %s5504_s26 }
 0x3b2   : > { %s5935_s14 = smov (!%p3742_p5), %s5493_s19  ;;  %s5660_s24 = smov (!%p3742_p5), 0  }
 0x3b3   : > { %s5662_s20 = smov (!%p3742_p5), 0  }
 0x3b6 LB: >> { %v3476_v36 = vld [vmem:[%s4046_s14] sm:$0xff]  ;;  %v3478_v39 = vld [vmem:[%s4046_s14 + $0x8] sm:$0xff]  ;;  %v3480_v45 = vld [vmem:[%s4046_s14 + $0x10] sm:$0xff]  ;;  %s3540_s21 = sadd.s32 1, %s4050_s24  ;;  %s3470_s20 = sadd.s32 1, %s4054_s20   ;;  %s4054_s20 = sphi %s5662_s20, %s3470_s20   ;;  %s4050_s24 = sphi %s5660_s24, %s5938_s24   ;;  %s4046_s14 = sphi %s5935_s14, %s5937_s14   ;;  %s4042_s18 = sphi %s5934_s18, %s5936_s18  }
 0x3b7   : >> { %3477 = vst [vmem:[%s4042_s18] sm:$0xff] %v3476_v36  ;;  %v3482_v8 = vld [vmem:[%s4046_s14 + $0x18] sm:$0xff]  ;;  %p3541_p6 = scmp.ge.s32.totalorder %s3540_s21, %s5651_s17  ;;  %v3484_v48 = vld [vmem:[%s4046_s14 + $0x20] sm:$0xff]  ;;  %v3486_v54 = vld [vmem:[%s4046_s14 + $0x28] sm:$0xff]  ;;  %p3469_p7 = scmp.ge.s32.totalorder %s3470_s20, %s5651_s17 }
 0x3b8   : >> { %3479 = vst [vmem:[%s4042_s18 + $0x8] sm:$0xff] %v3478_v39  ;;  %v3488_v3 = vld [vmem:[%s4046_s14 + $0x30] sm:$0xff]  ;;  %v3490_v21 = vld [vmem:[%s4046_s14 + $0x38] sm:$0xff]  ;;  %v3492_v46 = vld [vmem:[%s4046_s14 + $0x40] sm:$0xff] }
 0x3b9   : >> { %3481 = vst [vmem:[%s4042_s18 + $0x10] sm:$0xff] %v3480_v45  ;;  %s5952_s21 = smov (%p3541_p6, %s3540_s21), 0  ;;  %v3494_v16 = vld [vmem:[%s4046_s14 + $0x48] sm:$0xff]  ;;  %v3496_v57 = vld [vmem:[%s4046_s14 + $0x50] sm:$0xff]  ;;  %v3498_v15 = vld [vmem:[%s4046_s14 + $0x58] sm:$0xff] }
 0x3ba   : >> { %3483 = vst [vmem:[%s4042_s18 + $0x18] sm:$0xff] %v3482_v8  ;;  %s3743_s22 = sshll.u32 %s5952_s21, 8  ;;  %v3500_v18 = vld [vmem:[%s4046_s14 + $0x60] sm:$0xff]  ;;  %v3502_v29 = vld [vmem:[%s4046_s14 + $0x68] sm:$0xff]  ;;  %v3504_v0 = vld [vmem:[%s4046_s14 + $0x70] sm:$0xff]  ;;  %s5938_s24 = smov %s5952_s21 }
 0x3bb   : >> { %3485 = vst [vmem:[%s4042_s18 + $0x20] sm:$0xff] %v3484_v48  ;;  %s5694_s23 = scalar_lea.vmem %s5493_s19, %s3743_s22 [#allocation2]   ;;  %s5697_s15 = scalar_lea.vmem %s5504_s26, %s3743_s22   ;;  %v3506_v51 = vld [vmem:[%s4046_s14 + $0x78] sm:$0xff]  ;;  %v3508_v27 = vld [vmem:[%s4046_s14 + $0x80] sm:$0xff]  ;;  %v3510_v55 = vld [vmem:[%s4046_s14 + $0x88] sm:$0xff] }
 0x3bc   : >> { %3487 = vst [vmem:[%s4042_s18 + $0x28] sm:$0xff] %v3486_v54  ;;  %v3512_v47 = vld [vmem:[%s4046_s14 + $0x90] sm:$0xff]  ;;  %v3514_v63 = vld [vmem:[%s4046_s14 + $0x98] sm:$0xff]  ;;  %v3516_v42 = vld [vmem:[%s4046_s14 + $0xa0] sm:$0xff] }
 0x3bd   : >> { %3489 = vst [vmem:[%s4042_s18 + $0x30] sm:$0xff] %v3488_v3  ;;  %v3518_v22 = vld [vmem:[%s4046_s14 + $0xa8] sm:$0xff]  ;;  %v3520_v37 = vld [vmem:[%s4046_s14 + $0xb0] sm:$0xff]  ;;  %v3522_v61 = vld [vmem:[%s4046_s14 + $0xb8] sm:$0xff] }
 0x3be   : >> { %3491 = vst [vmem:[%s4042_s18 + $0x38] sm:$0xff] %v3490_v21  ;;  %v3524_v44 = vld [vmem:[%s4046_s14 + $0xc0] sm:$0xff]  ;;  %v3526_v7 = vld [vmem:[%s4046_s14 + $0xc8] sm:$0xff]  ;;  %v3528_v1 = vld [vmem:[%s4046_s14 + $0xd0] sm:$0xff] }
 0x3bf   : >> { %3493 = vst [vmem:[%s4042_s18 + $0x40] sm:$0xff] %v3492_v46  ;;  %v3530_v17 = vld [vmem:[%s4046_s14 + $0xd8] sm:$0xff]  ;;  %v3532_v23 = vld [vmem:[%s4046_s14 + $0xe0] sm:$0xff]  ;;  %v3534_v19 = vld [vmem:[%s4046_s14 + $0xe8] sm:$0xff] }
 0x3c0   : >> { %3495 = vst [vmem:[%s4042_s18 + $0x48] sm:$0xff] %v3494_v16  ;;  %v3536_v2 = vld [vmem:[%s4046_s14 + $0xf0] sm:$0xff]  ;;  %v3538_v5 = vld [vmem:[%s4046_s14 + $0xf8] sm:$0xff]  ;;  %s5937_s14 = smov %s5694_s23 }
 0x3c1   : >> { %3497 = vst [vmem:[%s4042_s18 + $0x50] sm:$0xff] %v3496_v57 }
 0x3c2   : >> { %3499 = vst [vmem:[%s4042_s18 + $0x58] sm:$0xff] %v3498_v15 }
 0x3c3   : >> { %3501 = vst [vmem:[%s4042_s18 + $0x60] sm:$0xff] %v3500_v18 }
 0x3c4   : >> { %3503 = vst [vmem:[%s4042_s18 + $0x68] sm:$0xff] %v3502_v29 }
 0x3c5   : >> { %3505 = vst [vmem:[%s4042_s18 + $0x70] sm:$0xff] %v3504_v0 }
 0x3c6   : >> { %3507 = vst [vmem:[%s4042_s18 + $0x78] sm:$0xff] %v3506_v51 }
 0x3c7   : >> { %3509 = vst [vmem:[%s4042_s18 + $0x80] sm:$0xff] %v3508_v27 }
 0x3c8   : >> { %3511 = vst [vmem:[%s4042_s18 + $0x88] sm:$0xff] %v3510_v55 }
 0x3c9   : >> { %3513 = vst [vmem:[%s4042_s18 + $0x90] sm:$0xff] %v3512_v47 }
 0x3ca   : >> { %3515 = vst [vmem:[%s4042_s18 + $0x98] sm:$0xff] %v3514_v63 }
 0x3cb   : >> { %3517 = vst [vmem:[%s4042_s18 + $0xa0] sm:$0xff] %v3516_v42 }
 0x3cc   : >> { %3519 = vst [vmem:[%s4042_s18 + $0xa8] sm:$0xff] %v3518_v22 }
 0x3cd   : >> { %3521 = vst [vmem:[%s4042_s18 + $0xb0] sm:$0xff] %v3520_v37 }
 0x3ce   : >> { %3523 = vst [vmem:[%s4042_s18 + $0xb8] sm:$0xff] %v3522_v61 }
 0x3cf   : >> { %3525 = vst [vmem:[%s4042_s18 + $0xc0] sm:$0xff] %v3524_v44 }
 0x3d0   : >> { %3527 = vst [vmem:[%s4042_s18 + $0xc8] sm:$0xff] %v3526_v7 }
 0x3d1   : >> { %3529 = vst [vmem:[%s4042_s18 + $0xd0] sm:$0xff] %v3528_v1 }
 0x3d2   : >> { %3531 = vst [vmem:[%s4042_s18 + $0xd8] sm:$0xff] %v3530_v17  ;;  %3472 = sbr.rel (!%p3469_p7) target bundleno = 950 (0x3b6), region = 184 }
 0x3d3   : >> { %3533 = vst [vmem:[%s4042_s18 + $0xe0] sm:$0xff] %v3532_v23 }
 0x3d4   : >> { %3535 = vst [vmem:[%s4042_s18 + $0xe8] sm:$0xff] %v3534_v19 }
 0x3d5   : >> { %3537 = vst [vmem:[%s4042_s18 + $0xf0] sm:$0xff] %v3536_v2 }
 0x3d6   : >> { %3539 = vst [vmem:[%s4042_s18 + $0xf8] sm:$0xff] %v3538_v5  ;;  %s5936_s18 = smov %s5697_s15 }
 0x3d7 PF: > { %s5763_s16 = sand.u32 31, %s3465_s11   ;;  %s3759_s27 = sshll.u32 %s5651_s17, 8 }
 0x3d8   : > { %s3551_s30 = scalar_lea.vmem %s5493_s19, %s3759_s27 [#allocation2]   ;;  %s3553_s22 = scalar_lea.vmem %s5504_s26, %s3759_s27  }
 0x3d9   : > { %p3748_p8 = scmp.le.s32.totalorder %s5763_s16, 0 }
 0x3da   : > { %s4056_s23 = smov (!%p3748_p8), %s3553_s22   ;;  %s4060_s15 = smov (!%p3748_p8), %s3551_s30  }
 0x3db   : > { %3692 = sbr.rel (%p3748_p8) target bundleno = 1000 (0x3e8), region = 189  ;;  %s4064_s21 = smov (!%p3748_p8), 0  }
 0x3dc   : > { %s4068_s13 = smov (!%p3748_p8), 0  }
 0x3e0 LB: >> { %v3563_v41 = vld [vmem:[%s4062_s15] sm:$0xff]  ;;  %s3565_s11 = sadd.s32 1, %s4066_s21  ;;  %s3557_s13 = sadd.s32 1, %s4070_s13   ;;  %s4070_s13 = sphi %s4068_s13, %s3557_s13   ;;  %s4066_s21 = sphi %s4064_s21, %s4065_s21   ;;  %s4062_s15 = sphi %s4060_s15, %s3570_s15   ;;  %s4058_s23 = sphi %s4056_s23, %s3571_s23  }
 0x3e1   : >> { %3564 = vst [vmem:[%s4058_s23] sm:$0xff] %v3563_v41  ;;  %p3566_p9 = scmp.ge.s32.totalorder %s3565_s11, %s5763_s16  ;;  %p3556_p10 = scmp.ge.s32.totalorder %s3557_s13, %s5763_s16 }
 0x3e3   : >> { %s5954_s11 = smov (%p3566_p9, %s3565_s11), 0  ;;  %3559 = sbr.rel (!%p3556_p10) target bundleno = 992 (0x3e0), region = 195 }
 0x3e4   : >> { %s3749_s17 = sshll.u32 %s5954_s11, 3  ;;  %s4065_s21 = smov %s5954_s11  }
 0x3e5   : >> { %s3570_s15 = scalar_lea.vmem %s3551_s30, %s3749_s17 [#allocation2]   ;;  %s3571_s23 = scalar_lea.vmem %s3553_s22, %s3749_s17  }
 0x3e8 PF: > { %s4073_s18 = smov 1   ;;  %s5939_s20 = scalar_lea.vmem %s5504_s26, %s5642_s10 }
 0x3e9   : > { %s3572_s14 = sshll.u32 %s4073_s18, %s5511_s9 }
 0x3ea   : > { %s3751_s24 = sadd.s32 4294967295, %s3572_s14 }
 0x3eb   : > { %v3582_v49 = vld [vmem:[%s3462_s12] sm:%s3751_s24] }
 0x3ec   : > { %3583 = vst [vmem:[%s5939_s20] sm:%s3751_s24] %v3582_v49 }
 0x3ed PF: > { %p3752_p11 = scmp.ge.u32.totalorder %s5506_s29, 8 }
 0x3ee   : > { %s4074_s13 = smov (!%p3752_p11), 1  }
 0x3ef   : > { %3332 = sbr.rel (%p3752_p11) target bundleno = 1014 (0x3f6), region = 64  ;;  %s3333_s16 = sshll.u32 (!%p3752_p11), %s4074_s13, %s5506_s29 }
 0x3f0   : > { %s3753_s27 = sadd.s32 (!%p3752_p11), 4294967295, %s3333_s16 }
 0x3f4   : > { %v3343_v6 = vld [vmem:[%s5493_s19] sm:%s3753_s27] }
 0x3f5   : > { %3344 = vst [vmem:[%s5504_s26] sm:%s3753_s27] %v3343_v6 }
 0x3f6 PF: > { %p14_p12 = scmp.ge.s32.totalorder %s4130_s28, 4   ;;  %s5940_s24 = smov %s4002_s25 }
 0x3f7   : > { %s5941_s25 = smov %s4138_s8  ;;  %s5942_s26 = smov %s4130_s28 }
 0x3f8   :  { %16 = sbr.rel (!%p14_p12) target bundleno = 2 (0x2), region = 206 }

</bundles_post_ra>
